<compile_context>
chip_gen: v5e
topology: v5e:2x2
jax: 0.10.0
libtpu: 0.0.40
codegen_flags: <defaults>
</compile_context>

<pallas_src>
import functools

import jax
import jax.numpy as jnp
from jax.experimental import pallas as pl
from jax.experimental.pallas import tpu as pltpu


def _convlstm_kernel(p_ref, w_ref, b_ref, c_ref, hc_ref, *, HID):
    # One fat MXU matmul: (TR, K) bf16 @ (K, 4*HID) bf16 -> f32 accumulate.
    z = jnp.dot(p_ref[...], w_ref[...], preferred_element_type=jnp.float32)
    z = z + b_ref[...]                           # (TR, 4*HID) f32, 4*HID = 128 lanes

    # Two EUP passes instead of four narrow ones.
    s = jax.nn.sigmoid(z[:, :3 * HID])           # (TR, 3*HID)  -> [i | f | o]
    g = jnp.tanh(z[:, 3 * HID:])                 # (TR, HID)

    i_g = s[:, :HID]
    f_g = s[:, HID:2 * HID]
    o_g = s[:, 2 * HID:]

    c_cur = c_ref[...]                           # (TR, HID) f32
    c_next = f_g * c_cur + i_g * g
    h_next = o_g * jnp.tanh(c_next)

    # Fused output block: [h_next | c_next].
    hc_ref[:, :HID] = h_next
    hc_ref[:, HID:] = c_next


def conv_lstm_cell_pallas(x, h_cur, c_cur, w_hwio, bias, kernel_size,
                          *, num_row_tiles=2):
    """x: (B,Cin,H,W) NCHW; h_cur/c_cur: (B,HID,H,W); w_hwio: (KH,KW,Cin+HID,4*HID);
    bias: (4*HID,).  Returns (h_next, c_next) in NCHW, matching the PyTorch module."""
    KH, KW = kernel_size
    assert KH % 2 == 1 and KW % 2 == 1, "only odd ('same' padding) kernels supported"
    ph, pw = KH // 2, KW // 2
    B, Cin, H, W = x.shape
    HID = h_cur.shape[1]
    C = Cin + HID
    K = KH * KW * C
    R = B * H * W                                 # total output rows (one per pixel)

    # --- layout prep (wrapper side; see TODO(synk) above about hoisting) ---------
    x_nhwc = jnp.transpose(x, (0, 2, 3, 1))
    h_nhwc = jnp.transpose(h_cur, (0, 2, 3, 1))
    comb = jnp.concatenate([x_nhwc, h_nhwc], axis=-1).astype(jnp.bfloat16)  # (B,H,W,C)
    comb_p = jnp.pad(comb, ((0, 0), (ph, ph), (pw, pw), (0, 0)))            # (B,Hp,Wp,C)

    # im2col: fused-K patches so the kernel runs a single fat matmul per block.
    patches = jnp.concatenate(
        [comb_p[:, ky:ky + H, kx:kx + W, :] for ky in range(KH) for kx in range(KW)],
        axis=-1)                                                            # (B,H,W,K)
    patches = patches.reshape(R, K)                                         # bf16

    c_flat = jnp.transpose(c_cur, (0, 2, 3, 1)).astype(jnp.float32).reshape(R, HID)
    w_flat = w_hwio.astype(jnp.bfloat16).reshape(K, 4 * HID)
    b2 = bias.astype(jnp.float32).reshape(1, 4 * HID)

    assert R % num_row_tiles == 0
    TR = R // num_row_tiles
    assert TR % 8 == 0, "row tile must be sublane aligned"

    kernel = functools.partial(_convlstm_kernel, HID=HID)

    hc = pl.pallas_call(
        kernel,
        grid=(num_row_tiles,),
        in_specs=[
            pl.BlockSpec((TR, K), lambda t: (t, 0)),           # patches (bf16)
            pl.BlockSpec((K, 4 * HID), lambda t: (0, 0)),      # weights (bf16)
            pl.BlockSpec((1, 4 * HID), lambda t: (0, 0)),      # bias (f32)
            pl.BlockSpec((TR, HID), lambda t: (t, 0)),         # c_cur (f32)
        ],
        out_specs=pl.BlockSpec((TR, 2 * HID), lambda t: (t, 0)),
        out_shape=jax.ShapeDtypeStruct((R, 2 * HID), jnp.float32),
        compiler_params=pltpu.CompilerParams(
            dimension_semantics=("parallel",)),                # 2 tiles -> 2 TCs on v7x
    )(patches, w_flat, b2, c_flat)

    hc = hc.reshape(B, H, W, 2 * HID)
    h_next = jnp.transpose(hc[..., :HID], (0, 3, 1, 2))
    c_next = jnp.transpose(hc[..., HID:], (0, 3, 1, 2))
    return h_next, c_next


def conv_lstm_cell_reference(x, h_cur, c_cur, w_hwio, bias, kernel_size):
    """Pure-JAX NCHW reference mirroring the PyTorch forward exactly (f32)."""
    KH, KW = kernel_size
    ph, pw = KH // 2, KW // 2
    hid = h_cur.shape[1]
    combined = jnp.concatenate([x, h_cur], axis=1)                   # (B, Cin+HID, H, W)
    w_oihw = jnp.transpose(w_hwio, (3, 2, 0, 1))                     # (4*HID, C, KH, KW)
    conv = jax.lax.conv_general_dilated(
        combined, w_oihw, window_strides=(1, 1),
        padding=((ph, ph), (pw, pw)),
        dimension_numbers=("NCHW", "OIHW", "NCHW"),
        precision=jax.lax.Precision.HIGHEST)
    conv = conv + bias[None, :, None, None]
    cc_i, cc_f, cc_o, cc_g = jnp.split(conv, [hid, 2 * hid, 3 * hid], axis=1)
    i = jax.nn.sigmoid(cc_i)
    f = jax.nn.sigmoid(cc_f)
    o = jax.nn.sigmoid(cc_o)
    g = jnp.tanh(cc_g)
    c_next = f * c_cur + i * g
    h_next = o * jnp.tanh(c_next)
    return h_next, c_next


if __name__ == "__main__":
    B, Cin, HID, H, W = 2, 4, 32, 16, 16
    KH = KW = 3
    C = Cin + HID

    key = jax.random.PRNGKey(0)
    kx, kh, kc, kw, kb = jax.random.split(key, 5)
    x = jax.random.normal(kx, (B, Cin, H, W), jnp.float32)
    h0 = jax.random.normal(kh, (B, HID, H, W), jnp.float32) * 0.5
    c0 = jax.random.normal(kc, (B, HID, H, W), jnp.float32) * 0.5
    # deterministic synthetic Conv2d(C -> 4*HID, 3x3) parameters (HWIO layout)
    w_hwio = jax.random.normal(kw, (KH, KW, C, 4 * HID), jnp.float32) * 0.1
    b = jax.random.normal(kb, (4 * HID,), jnp.float32) * 0.1

    h_next, c_next = conv_lstm_cell_pallas(x, h0, c0, w_hwio, b, (KH, KW))
    jax.block_until_ready((h_next, c_next))

    h_ref, c_ref = conv_lstm_cell_reference(x, h0, c0, w_hwio, b, (KH, KW))
    assert h_next.shape == (B, HID, H, W) and c_next.shape == (B, HID, H, W)
    # Tolerance widened (vs the old 1e-3) because matmul operands are bf16 now
    # (f32 accumulation); error budget ~1e-2 on z, well below 3e-2 on h/c.
    assert jnp.allclose(h_next, h_ref, atol=3e-2, rtol=3e-2), "h_next mismatch"
    assert jnp.allclose(c_next, c_ref, atol=3e-2, rtol=3e-2), "c_next mismatch"
    print("KERNEL_OK")
</pallas_src>

<mosaic_0001>
module attributes {stable_mosaic.version = 11 : i64} {
  func.func @_convlstm_kernel(%arg0: i32, %arg1: memref<256x324xbf16, #tpu.memory_space<vmem>>, %arg2: memref<324x128xbf16, #tpu.memory_space<vmem>>, %arg3: memref<1x128xf32, #tpu.memory_space<vmem>>, %arg4: memref<256x32xf32, #tpu.memory_space<vmem>>, %arg5: memref<256x64xf32, #tpu.memory_space<vmem>>) attributes {dimension_semantics = [#tpu.dimension_semantics<parallel>], iteration_bounds = array<i64: 2>, scalar_prefetch = 0 : i64, scratch_operands = 0 : i64, tpu.core_type = #tpu.core_type<tc>, window_params = [{transform_indices = @transform_0, window_bounds = array<i64: 256, 324>}, {pipeline_mode = #tpu.pipeline_mode<synchronous>, transform_indices = @transform_1, window_bounds = array<i64: 324, 128>}, {pipeline_mode = #tpu.pipeline_mode<synchronous>, transform_indices = @transform_2, window_bounds = array<i64: 1, 128>}, {transform_indices = @transform_3, window_bounds = array<i64: 256, 32>}, {transform_indices = @transform_4, window_bounds = array<i64: 256, 64>}]} {
    %c0 = arith.constant 0 : index
    %c0_0 = arith.constant 0 : index
    %0 = vector.load %arg1[%c0, %c0_0] : memref<256x324xbf16, #tpu.memory_space<vmem>>, vector<256x324xbf16>
    %c0_1 = arith.constant 0 : index
    %c0_2 = arith.constant 0 : index
    %1 = vector.load %arg2[%c0_1, %c0_2] : memref<324x128xbf16, #tpu.memory_space<vmem>>, vector<324x128xbf16>
    %cst = arith.constant dense<0.000000e+00> : vector<256x128xf32>
    %2 = tpu.matmul %0, %1, %cst {dimension_numbers = #tpu.dot_dimension_numbers<[1], [0], [0], [1], [0, 0, 1, 1], [], []>} : vector<256x324xbf16>, vector<324x128xbf16>, vector<256x128xf32> -> vector<256x128xf32>
    %c0_3 = arith.constant 0 : index
    %c0_4 = arith.constant 0 : index
    %3 = vector.load %arg3[%c0_3, %c0_4] : memref<1x128xf32, #tpu.memory_space<vmem>>, vector<1x128xf32>
    %4 = vector.broadcast %3 : vector<1x128xf32> to vector<256x128xf32>
    %5 = arith.addf %2, %4 : vector<256x128xf32>
    %6 = vector.extract_strided_slice %5 {offsets = [0, 0], sizes = [256, 96], strides = [1, 1]} : vector<256x128xf32> to vector<256x96xf32>
    %7 = arith.negf %6 : vector<256x96xf32>
    %8 = math.exp %7 : vector<256x96xf32>
    %cst_5 = arith.constant 1.000000e+00 : f32
    %9 = vector.broadcast %cst_5 : f32 to vector<256x96xf32>
    %10 = arith.addf %9, %8 : vector<256x96xf32>
    %11 = arith.divf %9, %10 : vector<256x96xf32>
    %12 = vector.extract_strided_slice %5 {offsets = [0, 96], sizes = [256, 32], strides = [1, 1]} : vector<256x128xf32> to vector<256x32xf32>
    %13 = math.tanh %12 : vector<256x32xf32>
    %14 = vector.extract_strided_slice %11 {offsets = [0, 0], sizes = [256, 32], strides = [1, 1]} : vector<256x96xf32> to vector<256x32xf32>
    %15 = vector.extract_strided_slice %11 {offsets = [0, 32], sizes = [256, 32], strides = [1, 1]} : vector<256x96xf32> to vector<256x32xf32>
    %16 = vector.extract_strided_slice %11 {offsets = [0, 64], sizes = [256, 32], strides = [1, 1]} : vector<256x96xf32> to vector<256x32xf32>
    %c0_6 = arith.constant 0 : index
    %c0_7 = arith.constant 0 : index
    %17 = vector.load %arg4[%c0_6, %c0_7] : memref<256x32xf32, #tpu.memory_space<vmem>>, vector<256x32xf32>
    %18 = arith.mulf %15, %17 : vector<256x32xf32>
    %19 = arith.mulf %14, %13 : vector<256x32xf32>
    %20 = arith.addf %18, %19 : vector<256x32xf32>
    %21 = math.tanh %20 : vector<256x32xf32>
    %22 = arith.mulf %16, %21 : vector<256x32xf32>
    %c0_8 = arith.constant 0 : index
    %c0_9 = arith.constant 0 : index
    %23 = vector.load %arg5[%c0_8, %c0_9] : memref<256x64xf32, #tpu.memory_space<vmem>>, vector<256x32xf32>
    tpu.vector_store %arg5[%c0_8, %c0_9], %22 {strides = array<i32>} : memref<256x64xf32, #tpu.memory_space<vmem>>, vector<256x32xf32>,
    %c0_10 = arith.constant 0 : index
    %c32 = arith.constant 32 : index
    %24 = vector.load %arg5[%c0_10, %c32] : memref<256x64xf32, #tpu.memory_space<vmem>>, vector<256x32xf32>
    tpu.vector_store %arg5[%c0_10, %c32], %20 {strides = array<i32>} : memref<256x64xf32, #tpu.memory_space<vmem>>, vector<256x32xf32>,
    return
  }
  func.func @transform_0(%arg0: i32) -> (i32, i32) {
    %c0_i32 = arith.constant 0 : i32
    %c0_i32_0 = arith.constant 0 : i32
    return %arg0, %c0_i32 : i32, i32
  }
  func.func @transform_1(%arg0: i32) -> (i32, i32) {
    %c0_i32 = arith.constant 0 : i32
    %c0_i32_0 = arith.constant 0 : i32
    %c0_i32_1 = arith.constant 0 : i32
    return %c0_i32, %c0_i32_0 : i32, i32
  }
  func.func @transform_2(%arg0: i32) -> (i32, i32) {
    %c0_i32 = arith.constant 0 : i32
    %c0_i32_0 = arith.constant 0 : i32
    %c0_i32_1 = arith.constant 0 : i32
    return %c0_i32, %c0_i32_0 : i32, i32
  }
  func.func @transform_3(%arg0: i32) -> (i32, i32) {
    %c0_i32 = arith.constant 0 : i32
    %c0_i32_0 = arith.constant 0 : i32
    return %arg0, %c0_i32 : i32, i32
  }
  func.func @transform_4(%arg0: i32) -> (i32, i32) {
    %c0_i32 = arith.constant 0 : i32
    %c0_i32_0 = arith.constant 0 : i32
    return %arg0, %c0_i32 : i32, i32
  }
}

</mosaic_0001>

<bundles_post_ra>
// kernel: tpu_custom_call.1
= control target key start
LH: loop header
LB: loop body
LE: loop exit
PB: predicated region body
PF: predicated region fallthrough
CT: control target
= control target key end

     0   :  { %s3351_s15 = smov 0   ;;  %s5131_s0 = inlined_call_operand.vmem [shape: bf16[512,324], index: 0, kind: input, shape index: {}]   ;;  %s5132_s1 = inlined_call_operand.vmem [shape: bf16[324,128], index: 1, kind: input, shape index: {}]   ;;  %s5133_s2 = inlined_call_operand.vmem [shape: f32[1,128], index: 2, kind: input, shape index: {}]   ;;  %s5134_s3 = inlined_call_operand.vmem [shape: f32[512,32], index: 3, kind: input, shape index: {}]   ;;  %s5135_s4 = inlined_call_operand.vmem [shape: f32[512,64], index: 4, kind: output, shape index: {}]  }
   0x1 LB: > { %s2625_s16 = sadd.s32 4294967295, %s3322_s15   ;;  %p2629_p0 = scmp.ge.s32.totalorder %s3322_s15, 1  ;;  %s3322_s15 = sphi %s3351_s15, %s14_s15  }
   0x2   : > { %p175_p1 = scmp.lt.s32.totalorder %s3322_s15, 3 }
   0x4   : > { %p176_p2 = pnand %p2629_p0, %p175_p1 }
   0x6   : > { %179 = sbr.rel (%p176_p2) target bundleno = 843 (0x34b), region = 36 }
   0xb   : > { %v3013_v0 = vld [vmem:[%s5132_s1 + $0x38] sm:$0xff]  ;;  %v331_v2 = vld [vmem:[%s5132_s1 + $0xa0] sm:$0x3]  ;;  %s2630_s23 = sshll.u32 %s2625_s16, 5  ;;  %vm748_vm0 = vcmask 1041408   ;;  %v3012_v4 = vld [vmem:[%s5132_s1 + $0x30] sm:$0xff] }
   0xc   : > { %v3365_v1 = vld [vmem:[%s5132_s1 + $0x78] sm:$0xff]  ;;  %v657_v3 = vunpack.c.l.b16 %v331_v2  ;;  %752 = vmatpush.bf16.msra.mxu0 %v3013_v0  ;;  %3026 = vmatpush.bf16.msra.mxu3 %v3013_v0  ;;  %v3377_v6 = vld [vmem:[%s5132_s1 + $0x70] sm:$0xff]  ;;  %p208_p3 = scmp.lt.s32.totalorder %s2630_s23, 63  ;;  %v3011_v9 = vld [vmem:[%s5132_s1 + $0x28] sm:$0xff]  ;;  %vm699_vm1 = vcmask 556032   ;;  %s3324_s19 = smov 32  }
   0xd   : > { %841 = vmatpush.bf16.msra.mxu1 %v3365_v1  ;;  %v3385_v8 = vld [vmem:[%s5132_s1 + $0x98] sm:$0xff]  ;;  %v3019_v10 = vld [vmem:[%s5132_s1 + $0x68] sm:$0xff]  ;;  %v3400_v11 = vld [vmem:[%s5132_s1 + $0x90] sm:$0xff] }
   0xe   : > { %v678_v5 = vpack.c.b16 %v657_v3, %v657_v3  ;;  %s5237_s23 = smov (!%p208_p3, %s2630_s23), 63  ;;  %v3010_v12 = vld [vmem:[%s5132_s1 + $0x20] sm:$0xff]  ;;  %v3415_v14 = vld [vmem:[%s5132_s1 + $0x88] sm:$0xff]  ;;  %v3009_v15 = vld [vmem:[%s5132_s1 + $0x18] sm:$0xff] }
   0xf   : > { %v3408_v13 = vld [vmem:[%s5132_s1 + $0x60] sm:$0xff]  ;;  %s3047_s14 = smul.u32 12, %s5237_s23  ;;  %v3017_v16 = vld [vmem:[%s5132_s1 + $0x58] sm:$0xff]  ;;  %v3008_v18 = vld [vmem:[%s5132_s1 + $0x10] sm:$0xff] }
  0x10   : > { %v3379_v7 = vsel %vm748_vm0, %v678_v5, 0  ;;  %753 = vmatpush.bf16.msra.mxu0 %v3012_v4  ;;  %3027 = vmatpush.bf16.msra.mxu3 %v3012_v4  ;;  %v3432_v17 = vld [vmem:[%s5132_s1 + $0x80] sm:$0xff]  ;;  %v3016_v21 = vld [vmem:[%s5132_s1 + $0x50] sm:$0xff]  ;;  %v3007_v23 = vld [vmem:[%s5132_s1 + $0x8] sm:$0xff] }
  0x11   : > { %933 = vmatpush.bf16.msra.mxu2 %v3379_v7  ;;  %842 = vmatpush.bf16.msra.mxu1 %v3377_v6  ;;  %s3427_s25 = scalar_lea.vmem %s5131_s0, %s3047_s14  ;;  %v3015_v24 = vld [vmem:[%s5132_s1 + $0x48] sm:$0xff]  ;;  %v3006_v25 = vld [vmem:[%s5132_s1] sm:$0xff]  ;;  %s2633_s14 = sshll.u32 %s5237_s23, 3 }
  0x12   : > { %v2646_v19 = vld [vmem:[%s3427_s25 + $0x8] sm:$0xf]  ;;  %v2960_v20 = vld [vmem:[%s3427_s25 + $0x10] sm:$0xf0]  ;;  %v3014_v26 = vld [vmem:[%s5132_s1 + $0x40] sm:$0xff]  ;;  %s3473_s18 = scalar_lea.vmem %s5134_s3, %s2633_s14  ;;  %s4932_s28 = scalar_lea.vmem %s5135_s4, %s2633_s14 }
  0x13   : > { %v2647_v22 = vor.u32 %v2960_v20, %v2646_v19  ;;  %v2638_v27 = vld [vmem:[%s3427_s25] sm:$0xf]  ;;  %v2959_v28 = vld [vmem:[%s3427_s25 + $0x8] sm:$0xf0]  ;;  %v2958_v31 = vld [vmem:[%s3427_s25 + $0x4] sm:$0xf] }
  0x14   : > { %754 = vmatpush.bf16.msra.mxu0 %v3011_v9  ;;  %3028 = vmatpush.bf16.msra.mxu3 %v3011_v9  ;;  %v2782_v29 = vld [vmem:[%s3427_s25 + $0x120] sm:$0xf]  ;;  %v2995_v30 = vld [vmem:[%s3427_s25 + $0x128] sm:$0xf0]  ;;  %v2640_v32 = vld [vmem:[%s3427_s25 + $0xc] sm:$0xf0]  ;;  %v2639_v33 = vor.u32 %v2959_v28, %v2638_v27 }
  0x15   : > { %934 = vmatpush.bf16.msra.mxu2 %v3385_v8  ;;  %843 = vmatpush.bf16.msra.mxu1 %v3019_v10  ;;  %v2783_v34 = vor.u32 %v2995_v30, %v2782_v29  ;;  %v2643_v35 = vor.u32 %v2958_v31, %v2640_v32  ;;  %v2658_v36 = vld [vmem:[%s3427_s25 + $0x20] sm:$0xf]  ;;  %v2963_v37 = vld [vmem:[%s3427_s25 + $0x28] sm:$0xf0]  ;;  %v2650_v40 = vld [vmem:[%s3427_s25 + $0x18] sm:$0xf] }
  0x16   : > { %v2659_v38 = vor.u32 %v2963_v37, %v2658_v36  ;;  %v1659_v39 = vld [vmem:[%s3473_s18] sm:$0xff]  ;;  %v2794_v42 = vld [vmem:[%s3427_s25 + $0x138] sm:$0xf]  ;;  %v2961_v44 = vld [vmem:[%s3427_s25 + $0x1c] sm:$0xf] }
  0x17   : > { %v2962_v41 = vld [vmem:[%s3427_s25 + $0x20] sm:$0xf0]  ;;  %1723 = vrot.lane.b32.xlu0 %v1659_v39, %s3324_s19  ;;  %v2652_v45 = vld [vmem:[%s3427_s25 + $0x24] sm:$0xf0]  ;;  %v2670_v49 = vld [vmem:[%s3427_s25 + $0x38] sm:$0xf] }
  0x18   : > { %755 = vmatpush.bf16.msra.mxu0 %v3010_v12  ;;  %3029 = vmatpush.bf16.msra.mxu3 %v3010_v12  ;;  %v2998_v43 = vld [vmem:[%s3427_s25 + $0x140] sm:$0xf0]  ;;  %v2651_v46 = vor.u32 %v2962_v41, %v2650_v40  ;;  %v2655_v48 = vor.u32 %v2961_v44, %v2652_v45  ;;  %v1660_v51 = vld [vmem:[%s3473_s18 + $0x8] sm:$0xff]  ;;  %v2662_v53 = vld [vmem:[%s3427_s25 + $0x30] sm:$0xf] }
  0x19   : > { %935 = vmatpush.bf16.msra.mxu2 %v3400_v11  ;;  %844 = vmatpush.bf16.msra.mxu1 %v3408_v13  ;;  %v2795_v47 = vor.u32 %v2998_v43, %v2794_v42  ;;  %v2966_v50 = vld [vmem:[%s3427_s25 + $0x40] sm:$0xf0]  ;;  %v1661_v55 = vld [vmem:[%s3473_s18 + $0x10] sm:$0xff]  ;;  %v2965_v56 = vld [vmem:[%s3427_s25 + $0x38] sm:$0xf0] }
  0x1a   : > { %v2671_v52 = vor.u32 %v2966_v50, %v2670_v49  ;;  %v1663_v54 = vld [vmem:[%s3473_s18 + $0x20] sm:$0xff]  ;;  %v2806_v57 = vld [vmem:[%s3427_s25 + $0x150] sm:$0xf]  ;;  %1727 = vrot.lane.b32.xlu1 %v1661_v55, %s3324_s19  ;;  %v3001_v58 = vld [vmem:[%s3427_s25 + $0x158] sm:$0xf0]  ;;  %v2663_v61 = vor.u32 %v2965_v56, %v2662_v53 }
  0x1b   : > { %1731 = vrot.lane.b32.xlu2 %v1663_v54, %s3324_s19  ;;  %v2964_v59 = vld [vmem:[%s3427_s25 + $0x34] sm:$0xf]  ;;  %v2664_v60 = vld [vmem:[%s3427_s25 + $0x3c] sm:$0xf0]  ;;  %v2807_v62 = vor.u32 %v3001_v58, %v2806_v57  ;;  %v2682_v0 = vld [vmem:[%s3427_s25 + $0x50] sm:$0xf] }
  0x1c   : > { %756 = vmatpush.bf16.msra.mxu0 %v3009_v15  ;;  %3030 = vmatpush.bf16.msra.mxu3 %v3009_v15  ;;  %v2667_v63 = vor.u32 %v2964_v59, %v2664_v60  ;;  %v1664_v2 = vld [vmem:[%s3473_s18 + $0x28] sm:$0xff]  ;;  %v1662_v3 = vld [vmem:[%s3473_s18 + $0x18] sm:$0xff]  ;;  %v1667_v5 = vld [vmem:[%s3473_s18 + $0x40] sm:$0xff] }
  0x1d   : > { %936 = vmatpush.bf16.msra.mxu2 %v3415_v14  ;;  %845 = vmatpush.bf16.msra.mxu1 %v3017_v16  ;;  %v2818_v9 = vld [vmem:[%s3427_s25 + $0x168] sm:$0xf]  ;;  %v2967_v12 = vld [vmem:[%s3427_s25 + $0x4c] sm:$0xf]  ;;  %v1670_v19 = vld [vmem:[%s3473_s18 + $0x58] sm:$0xff] }
  0x1e   : > { %v1666_v20 = vld [vmem:[%s3473_s18 + $0x38] sm:$0xff]  ;;  %v2970_v27 = vld [vmem:[%s3427_s25 + $0x64] sm:$0xf]  ;;  %v2688_v28 = vld [vmem:[%s3427_s25 + $0x6c] sm:$0xf0] }
  0x1f   : > { %1725 = vrot.lane.b32.xlu0 %v1660_v51, %s3324_s19  ;;  %v2994_v29 = vld [vmem:[%s3427_s25 + $0x124] sm:$0xf]  ;;  %v2784_v30 = vld [vmem:[%s3427_s25 + $0x12c] sm:$0xf0]  ;;  %v2691_v32 = vor.u32 %v2970_v27, %v2688_v28  ;;  %v1676_v36 = vld [vmem:[%s3473_s18 + $0x88] sm:$0xff] }
  0x20   : > { %757 = vmatpush.bf16.msra.mxu0 %v3008_v18  ;;  %3031 = vmatpush.bf16.msra.mxu3 %v3008_v18  ;;  %v2972_v18 = vld [vmem:[%s3427_s25 + $0x70] sm:$0xf0]  ;;  %v1672_v37 = vld [vmem:[%s3473_s18 + $0x68] sm:$0xff]  ;;  %v2698_v40 = vld [vmem:[%s3427_s25 + $0x78] sm:$0xf] }
  0x21   : > { %937 = vmatpush.bf16.msra.mxu2 %v3432_v17  ;;  %846 = vmatpush.bf16.msra.mxu1 %v3016_v21  ;;  %v1679_v41 = vld [vmem:[%s3473_s18 + $0xa0] sm:$0xff]  ;;  %v1677_v43 = vld [vmem:[%s3473_s18 + $0x90] sm:$0xff]  ;;  %v2973_v45 = vld [vmem:[%s3427_s25 + $0x7c] sm:$0xf] }
  0x22   : > { %1729 = vrot.lane.b32.xlu1 %v1662_v3, %s3324_s19  ;;  %v1675_v42 = vld [vmem:[%s3473_s18 + $0x80] sm:$0xff]  ;;  %v1682_v54 = vld [vmem:[%s3473_s18 + $0xb8] sm:$0xff]  ;;  %v1680_v56 = vld [vmem:[%s3473_s18 + $0xa8] sm:$0xff] }
  0x23   : > { %1733 = vrot.lane.b32.xlu2 %v1664_v2, %s3324_s19  ;;  %v2974_v44 = vld [vmem:[%s3427_s25 + $0x80] sm:$0xf0]  ;;  %v1678_v55 = vld [vmem:[%s3473_s18 + $0x98] sm:$0xff]  ;;  %v2710_v58 = vld [vmem:[%s3427_s25 + $0x90] sm:$0xf] }
  0x24   : > { %2908 = vmatmul.msk.bf16.vlgmr.msra.gmra.mxu2 %vm699_vm1, %v2647_v22  ;;  %758 = vmatpush.bf16.msra.mxu0 %v3007_v23  ;;  %v2686_v22 = vld [vmem:[%s3427_s25 + $0x60] sm:$0xf]  ;;  %v2699_v49 = vor.u32 %v2974_v44, %v2698_v40  ;;  %v2978_v53 = vld [vmem:[%s3427_s25 + $0xa0] sm:$0xf0]  ;;  %v2977_v59 = vld [vmem:[%s3427_s25 + $0x98] sm:$0xf0] }
  0x25   : > { %3032 = vmatpush.bf16.msra.mxu3 %v3007_v23  ;;  %847 = vmatpush.bf16.msra.mxu1 %v3015_v24  ;;  %v1673_v23 = vld [vmem:[%s3473_s18 + $0x70] sm:$0xff]  ;;  %v1683_v2 = vld [vmem:[%s3473_s18 + $0xc0] sm:$0xff]  ;;  %v2711_v3 = vor.u32 %v2977_v59, %v2710_v58  ;;  %v2814_v58 = vld [vmem:[%s3427_s25 + $0x158] sm:$0xf] }
  0x26   : > { %v2976_v60 = vld [vmem:[%s3427_s25 + $0x94] sm:$0xf]  ;;  %v3612_v27 = vld [vmem:[%s5133_s2] ss:$0 sm:$0xff]  ;;  %v3002_v59 = vld [vmem:[%s3427_s25 + $0x160] sm:$0xf0] }
  0x27   : > { %v2734_v28 = vld [vmem:[%s3427_s25 + $0xc0] sm:$0xf] }
  0x28   : > { %759 = vmatpush.bf16.msra.mxu0 %v3006_v25 }
  0x29   : > { %3033 = vmatpush.bf16.msra.mxu3 %v3006_v25  ;;  %848 = vmatpush.bf16.msra.mxu1 %v3014_v26  ;;  %v1671_v25 = vld [vmem:[%s3473_s18 + $0x60] sm:$0xff] }
  0x2a   : > { %1737 = vrot.lane.b32.xlu1 %v1666_v20, %s3324_s19  ;;  %v1689_v20 = vld [vmem:[%s3473_s18 + $0xf0] sm:$0xff] }
  0x2b   : > { %760 = vmatmul.bf16.vlgmr.msra.gmra.mxu0 %v2639_v33  ;;  %1739 = vrot.lane.b32.xlu2 %v1667_v5, %s3324_s19  ;;  %v2787_v33 = vor.u32 %v2994_v29, %v2784_v30  ;;  %v2983_v29 = vld [vmem:[%s3427_s25 + $0xc8] sm:$0xf0]  ;;  %v2982_v30 = vld [vmem:[%s3427_s25 + $0xc4] sm:$0xf] }
  0x2c   : > { %820 = vmatmul.bf16.vlgmr.msra.gmra.mxu3 %v2783_v34  ;;  %849 = vmatmul.bf16.vlgmr.msra.gmra.mxu1 %v2643_v35  ;;  %v2706_v34 = vld [vmem:[%s3427_s25 + $0x80] sm:$0xf]  ;;  %v2975_v35 = vld [vmem:[%s3427_s25 + $0x88] sm:$0xf0] }
  0x2d   : > { %3034 = vmatpush.bf16.msrb.mxu3 %v3365_v1  ;;  %v2969_v1 = vld [vmem:[%s3427_s25 + $0x58] sm:$0xf0]  ;;  %v2707_v39 = vor.u32 %v2975_v35, %v2706_v34  ;;  %v2735_v35 = vor.u32 %v2983_v29, %v2734_v28 }
  0x2e   : > { %v2683_v4 = vor.u32 %v2969_v1, %v2682_v0  ;;  %v1685_v0 = vld [vmem:[%s3473_s18 + $0xd0] sm:$0xff] }
  0x2f   : > { %v1681_v1 = vld [vmem:[%s3473_s18 + $0xb0] sm:$0xff] }
  0x31   : > { %3035 = vmatpush.bf16.msrb.mxu3 %v3377_v6  ;;  %v1665_v6 = vld [vmem:[%s3473_s18 + $0x30] sm:$0xff] }
  0x32   : > { %1735 = vrot.lane.b32.xlu0 %v1665_v6, %s3324_s19  ;;  %v2730_v6 = vld [vmem:[%s3427_s25 + $0xb0] sm:$0xf] }
  0x33   : > { %1745 = vrot.lane.b32.xlu2 %v1670_v19, %s3324_s19  ;;  %v1687_v19 = vld [vmem:[%s3473_s18 + $0xe0] sm:$0xff] }
  0x34   : > { %2909 = vmatmul.msk.bf16.gmra.mxu2 %vm699_vm1, %v2659_v38  ;;  %v1674_v38 = vld [vmem:[%s3473_s18 + $0x78] sm:$0xff] }
  0x35   : > { %3036 = vmatpush.bf16.msrb.mxu3 %v3019_v10  ;;  %v3004_v10 = vld [vmem:[%s3427_s25 + $0x170] sm:$0xf0] }
  0x36   : > { %v2819_v15 = vor.u32 %v3004_v10, %v2818_v9  ;;  %v1684_v9 = vld [vmem:[%s3473_s18 + $0xc8] sm:$0xff]  ;;  %v1686_v10 = vld [vmem:[%s3473_s18 + $0xd8] sm:$0xff] }
  0x39   : > { %3037 = vmatpush.bf16.msrb.mxu3 %v3408_v13  ;;  %v2676_v13 = vld [vmem:[%s3427_s25 + $0x54] sm:$0xf0] }
  0x3b   : > { %765 = vmatmul.bf16.gmra.mxu0 %v2651_v46  ;;  %1751 = vrot.lane.b32.xlu2 %v1673_v23, %s3324_s19  ;;  %v2700_v46 = vld [vmem:[%s3427_s25 + $0x84] sm:$0xf0] }
  0x3c   : > { %825 = vmatmul.bf16.gmra.mxu3 %v2795_v47  ;;  %854 = vmatmul.bf16.gmra.mxu1 %v2655_v48  ;;  %v2997_v47 = vld [vmem:[%s3427_s25 + $0x13c] sm:$0xf]  ;;  %v2796_v48 = vld [vmem:[%s3427_s25 + $0x144] sm:$0xf0]  ;;  %v2703_v50 = vor.u32 %v2973_v45, %v2700_v46 }
  0x3d   : > { %3038 = vmatpush.bf16.msrb.mxu3 %v3017_v16  ;;  %v2694_v16 = vld [vmem:[%s3427_s25 + $0x68] sm:$0xf]  ;;  %v2799_v51 = vor.u32 %v2997_v47, %v2796_v48 }
  0x3e   : > { %v2742_v23 = vld [vmem:[%s3427_s25 + $0xc8] sm:$0xf] }
  0x41   : > { %3039 = vmatpush.bf16.msrb.mxu3 %v3016_v21  ;;  %v1668_v21 = vld [vmem:[%s3473_s18 + $0x48] sm:$0xff] }
  0x42   : > { %1741 = vrot.lane.b32.xlu0 %v1668_v21, %s3324_s19 }
  0x43   : > { %1757 = vrot.lane.b32.xlu2 %v1676_v36, %s3324_s19 }
  0x44   : > { %2910 = vmatmul.msk.bf16.gmra.mxu2 %vm699_vm1, %v2671_v52  ;;  %v2718_v52 = vld [vmem:[%s3427_s25 + $0x98] sm:$0xf] }
  0x45   : > { %3040 = vmatpush.bf16.msrb.mxu3 %v3015_v24  ;;  %v1669_v24 = vld [vmem:[%s3473_s18 + $0x50] sm:$0xff]  ;;  %v2719_v57 = vor.u32 %v2978_v53, %v2718_v52  ;;  %v2746_v52 = vld [vmem:[%s3427_s25 + $0xd8] sm:$0xf]  ;;  %v2986_v53 = vld [vmem:[%s3427_s25 + $0xe0] sm:$0xf0] }
  0x46   : > { %1743 = vrot.lane.b32.xlu1 %v1669_v24, %s3324_s19  ;;  %v2984_v24 = vld [vmem:[%s3427_s25 + $0xd0] sm:$0xf0] }
  0x49   : > { %3041 = vmatpush.bf16.msrb.mxu3 %v3014_v26  ;;  %v2971_v26 = vld [vmem:[%s3427_s25 + $0x68] sm:$0xf0] }
  0x4a   : > { %1747 = vrot.lane.b32.xlu0 %v1671_v25, %s3324_s19  ;;  %v2687_v31 = vor.u32 %v2971_v26, %v2686_v22  ;;  %v1690_v25 = vld [vmem:[%s3473_s18 + $0xf8] sm:$0xff]  ;;  %v2743_v26 = vor.u32 %v2984_v24, %v2742_v23  ;;  %v2760_v23 = vld [vmem:[%s3427_s25 + $0xfc] sm:$0xf0]  ;;  %v2826_v24 = vld [vmem:[%s3427_s25 + $0x170] sm:$0xf] }
  0x4b   : > { %770 = vmatmul.bf16.gmra.mxu0 %v2663_v61  ;;  %1763 = vrot.lane.b32.xlu2 %v1679_v41, %s3324_s19  ;;  %v2712_v61 = vld [vmem:[%s3427_s25 + $0x9c] sm:$0xf0] }
  0x4c   : > { %830 = vmatmul.bf16.gmra.mxu3 %v2807_v62  ;;  %859 = vmatmul.bf16.gmra.mxu1 %v2667_v63  ;;  %v3000_v62 = vld [vmem:[%s3427_s25 + $0x154] sm:$0xf]  ;;  %v2808_v63 = vld [vmem:[%s3427_s25 + $0x15c] sm:$0xf0] }
  0x4d   : > { %3042 = vmatpush.bf16.msra.mxu3 %v3379_v7  ;;  %v2674_v7 = vld [vmem:[%s3427_s25 + $0x48] sm:$0xf]  ;;  %v2811_v5 = vor.u32 %v3000_v62, %v2808_v63  ;;  %v2747_v62 = vor.u32 %v2986_v53, %v2746_v52  ;;  %v2992_v53 = vld [vmem:[%s3427_s25 + $0x110] sm:$0xf0] }
  0x4e   : > { %1749 = vrot.lane.b32.xlu1 %v1672_v37, %s3324_s19  ;;  %v2770_v52 = vld [vmem:[%s3427_s25 + $0x108] sm:$0xf] }
  0x51   : > { %3043 = vmatpush.bf16.msra.mxu3 %v3385_v8  ;;  %v2968_v8 = vld [vmem:[%s3427_s25 + $0x50] sm:$0xf0] }
  0x52   : > { %1753 = vrot.lane.b32.xlu0 %v1674_v38, %s3324_s19 }
  0x53   : > { %1769 = vrot.lane.b32.xlu2 %v1682_v54, %s3324_s19  ;;  %v2985_v54 = vld [vmem:[%s3427_s25 + $0xdc] sm:$0xf] }
  0x54   : > { %2911 = vmatmul.msk.bf16.gmra.mxu2 %vm699_vm1, %v2683_v4  ;;  %v2715_v4 = vor.u32 %v2976_v60, %v2712_v61 }
  0x55   : > { %3044 = vmatpush.bf16.msra.mxu3 %v3400_v11  ;;  %v2675_v11 = vor.u32 %v2968_v8, %v2674_v7  ;;  %v2981_v7 = vld [vmem:[%s3427_s25 + $0xb8] sm:$0xf0]  ;;  %v1688_v8 = vld [vmem:[%s3473_s18 + $0xe8] sm:$0xff] }
  0x56   : > { %1755 = vrot.lane.b32.xlu1 %v1675_v42, %s3324_s19  ;;  %v2754_v42 = vld [vmem:[%s3427_s25 + $0xe0] sm:$0xf] }
  0x59   : > { %3045 = vmatpush.bf16.msra.mxu3 %v3415_v14  ;;  %v2679_v14 = vor.u32 %v2967_v12, %v2676_v13  ;;  %v2731_v12 = vor.u32 %v2981_v7, %v2730_v6  ;;  %v2722_v13 = vld [vmem:[%s3427_s25 + $0xa8] sm:$0xf]  ;;  %v2990_v6 = vld [vmem:[%s3427_s25 + $0x100] sm:$0xf0] }
  0x5a   : > { %1759 = vrot.lane.b32.xlu0 %v1677_v43, %s3324_s19  ;;  %v2987_v43 = vld [vmem:[%s3427_s25 + $0xe8] sm:$0xf0] }
  0x5b   : > { %775 = vmatmul.bf16.gmra.mxu0 %v2675_v11  ;;  %1775 = vrot.lane.b32.xlu2 %v1685_v0, %s3324_s19  ;;  %v2980_v11 = vld [vmem:[%s3427_s25 + $0xb0] sm:$0xf0]  ;;  %v2755_v47 = vor.u32 %v2987_v43, %v2754_v42 }
  0x5c   : > { %835 = vmatmul.bf16.gmra.mxu3 %v2819_v15  ;;  %864 = vmatmul.bf16.gmra.mxu1 %v2679_v14  ;;  %v2979_v15 = vld [vmem:[%s3427_s25 + $0xac] sm:$0xf]  ;;  %v2724_v14 = vld [vmem:[%s3427_s25 + $0xb4] sm:$0xf0]  ;;  %v2723_v21 = vor.u32 %v2980_v11, %v2722_v13 }
  0x5d   : > { %3046 = vmatpush.bf16.msra.mxu3 %v3432_v17  ;;  %v2695_v17 = vor.u32 %v2972_v18, %v2694_v16  ;;  %v3003_v16 = vld [vmem:[%s3427_s25 + $0x16c] sm:$0xf]  ;;  %v2820_v18 = vld [vmem:[%s3427_s25 + $0x174] sm:$0xf0] }
  0x5e   : > { %1761 = vrot.lane.b32.xlu1 %v1678_v55, %s3324_s19  ;;  %v2823_v22 = vor.u32 %v3003_v16, %v2820_v18  ;;  %v2758_v18 = vld [vmem:[%s3427_s25 + $0xf0] sm:$0xf] }
  0x62   : > { %1765 = vrot.lane.b32.xlu0 %v1680_v56, %s3324_s19 }
  0x63   : > { %1781 = vrot.lane.b32.xlu2 %v1688_v8, %s3324_s19 }
  0x64   : > { %2912 = vmatmul.msk.bf16.gmra.mxu2 %vm699_vm1, %v2695_v17  ;;  %v2727_v17 = vor.u32 %v2979_v15, %v2724_v14 }
  0x66   : > { %1767 = vrot.lane.b32.xlu1 %v1681_v1, %s3324_s19  ;;  %v2815_v1 = vor.u32 %v3002_v59, %v2814_v58  ;;  %v2772_v58 = vld [vmem:[%s3427_s25 + $0x114] sm:$0xf0] }
  0x6a   : > { %1771 = vrot.lane.b32.xlu0 %v1683_v2, %s3324_s19 }
  0x6b   : > { %780 = vmatmul.bf16.gmra.mxu0 %v2687_v31  ;;  %v2736_v31 = vld [vmem:[%s3427_s25 + $0xcc] sm:$0xf0] }
  0x6c   : > { %869 = vmatmul.bf16.gmra.mxu1 %v2691_v32  ;;  %909 = vmatmul.bf16.vlgmr.msrb.gmra.mxu3 %v2787_v33  ;;  %v2802_v32 = vld [vmem:[%s3427_s25 + $0x140] sm:$0xf]  ;;  %v2999_v33 = vld [vmem:[%s3427_s25 + $0x148] sm:$0xf0]  ;;  %v2739_v37 = vor.u32 %v2982_v30, %v2736_v31 }
  0x6d   : > { %v2803_v38 = vor.u32 %v2999_v33, %v2802_v32 }
  0x6e   : > { %1773 = vrot.lane.b32.xlu1 %v1684_v9, %s3324_s19 }
  0x72   : > { %1777 = vrot.lane.b32.xlu0 %v1686_v10, %s3324_s19 }
  0x74   : > { %2913 = vmatmul.msk.bf16.gmra.mxu2 %vm699_vm1, %v2707_v39 }
  0x75   : > { %v3655_v16 = vpop.permute.xlu2 %1731 }
  0x76   : > { %1779 = vrot.lane.b32.xlu1 %v1687_v19, %s3324_s19  ;;  %v2989_v19 = vld [vmem:[%s3427_s25 + $0xf8] sm:$0xf0] }
  0x77   : > { %v2759_v29 = vor.u32 %v2989_v19, %v2758_v18 }
  0x7a   : > { %1783 = vrot.lane.b32.xlu0 %v1689_v20, %s3324_s19  ;;  %v2988_v20 = vld [vmem:[%s3427_s25 + $0xf4] sm:$0xf] }
  0x7b   : > { %785 = vmatmul.bf16.gmra.mxu0 %v2699_v49  ;;  %v2763_v31 = vor.u32 %v2988_v20, %v2760_v23 }
  0x7c   : > { %874 = vmatmul.bf16.gmra.mxu1 %v2703_v50  ;;  %914 = vmatmul.bf16.gmra.mxu3 %v2799_v51 }
  0x7e   : > { %1785 = vrot.lane.b32.xlu1 %v1690_v25, %s3324_s19  ;;  %v3005_v25 = vld [vmem:[%s3427_s25 + $0x178] sm:$0xf0] }
  0x7f   : > { %v2827_v32 = vor.u32 %v3005_v25, %v2826_v24 }
  0x84   : > { %2914 = vmatmul.msk.bf16.gmra.mxu2 %vm699_vm1, %v2719_v57  ;;  %v2748_v57 = vld [vmem:[%s3427_s25 + $0xe4] sm:$0xf0] }
  0x85   : > { %v2751_v0 = vor.u32 %v2985_v54, %v2748_v57  ;;  %v2991_v57 = vld [vmem:[%s3427_s25 + $0x10c] sm:$0xf] }
  0x8b   : > { %790 = vmatmul.bf16.gmra.mxu0 %v2711_v3 }
  0x8c   : > { %879 = vmatmul.bf16.gmra.mxu1 %v2715_v4  ;;  %919 = vmatmul.bf16.gmra.mxu3 %v2811_v5  ;;  %v2766_v5 = vld [vmem:[%s3427_s25 + $0xf8] sm:$0xf] }
  0x94   : > { %2915 = vmatmul.msk.bf16.gmra.mxu2 %vm699_vm1, %v2731_v12  ;;  %v2767_v12 = vor.u32 %v2990_v6, %v2766_v5 }
  0x9b   : > { %795 = vmatmul.bf16.gmra.mxu0 %v2723_v21 }
  0x9c   : > { %884 = vmatmul.bf16.gmra.mxu1 %v2727_v17  ;;  %924 = vmatmul.bf16.gmra.mxu3 %v2823_v22  ;;  %v3662_v22 = vpop.permute.xlu0 %1723 }
  0xa4   : > { %2916 = vmatmul.msk.bf16.gmra.mxu2 %vm699_vm1, %v2743_v26 }
  0xa7   : > { %v939_v34 = vpop.f32.mrf.mxu2 }
  0xa8   : > { %v761_v36 = vpop.f32.mrf.mxu0 }
  0xa9   : > { %v762_v39 = vadd.f32 %v3612_v27, %v761_v36  ;;  %v850_v40 = vpop.f32.mrf.mxu1  ;;  %v2778_v36 = vld [vmem:[%s3427_s25 + $0x110] sm:$0xf] }
  0xab   : > { %v851_v41 = vadd.f32 %v850_v40, %v762_v39  ;;  %800 = vmatmul.bf16.gmra.mxu0 %v2735_v35 }
  0xac   : > { %889 = vmatmul.bf16.gmra.mxu1 %v2739_v37  ;;  %2921 = vmatmul.msk.bf16.vlgmr.msra.gmra.mxu3 %vm699_vm1, %v2803_v38  ;;  %v2993_v37 = vld [vmem:[%s3427_s25 + $0x118] sm:$0xf0]  ;;  %v3675_v38 = vpop.permute.xlu1 %1727 }
  0xad   : > { %v3624_v44 = vadd.f32 %v939_v34, %v851_v41  ;;  %v3679_v41 = vpop.permute.xlu2 %1733 }
  0xaf   : > { %v941_v45 = vpop.f32.mrf.mxu2  ;;  %3059 = vtanh.f32 %v3624_v44  ;;  %v3627_v46 = vpop.f32.mrf.mxu3 }
  0xb0   : > { %v763_v48 = vpop.f32.mrf.mxu0 }
  0xb1   : > { %v764_v49 = vadd.f32 %v3612_v27, %v763_v48  ;;  %v852_v50 = vpop.f32.mrf.mxu1 }
  0xb3   : > { %v853_v51 = vadd.f32 %v852_v50, %v764_v49 }
  0xb4   : > { %2917 = vmatmul.msk.bf16.gmra.mxu2 %vm699_vm1, %v2755_v47  ;;  %v2779_v47 = vor.u32 %v2993_v37, %v2778_v36 }
  0xb5   : > { %v3060_v55 = vpop.eup %3059  ;;  %v3634_v56 = vadd.f32 %v941_v45, %v853_v51  ;;  %v3685_v45 = vpop.permute.xlu0 %1725 }
  0xb6   : > { %1883 = vrot.lane.b32.xlu2 %v3060_v55, %s3324_s19 }
  0xb7   : > { %v944_v60 = vpop.f32.mrf.mxu2  ;;  %3061 = vtanh.f32 %v3634_v56  ;;  %v3641_v61 = vpop.f32.mrf.mxu3 }
  0xb8   : > { %v766_v63 = vpop.f32.mrf.mxu0 }
  0xb9   : > { %v767_v2 = vadd.f32 %v3612_v27, %v766_v63  ;;  %v855_v3 = vpop.f32.mrf.mxu1  ;;  %v2771_v63 = vor.u32 %v2992_v53, %v2770_v52 }
  0xbb   : > { %v856_v4 = vadd.f32 %v855_v3, %v767_v2  ;;  %805 = vmatmul.bf16.gmra.mxu0 %v2747_v62  ;;  %v2775_v2 = vor.u32 %v2991_v57, %v2772_v58  ;;  %v3703_v3 = vpop.permute.xlu2 %1739 }
  0xbc   : > { %894 = vmatmul.bf16.gmra.mxu1 %v2751_v0  ;;  %2922 = vmatmul.msk.bf16.gmra.mxu3 %vm699_vm1, %v2815_v1 }
  0xbd   : > { %v3062_v7 = vpop.eup %3061  ;;  %v3647_v8 = vadd.f32 %v944_v60, %v856_v4  ;;  %v3696_v60 = vpop.permute.xlu1 %1729 }
  0xbe   : > { %1885 = vrot.lane.b32.xlu0 %v3062_v7, %s3324_s19  ;;  %v3701_v0 = vpop.permute.xlu0 %1735  ;;  %v2790_v7 = vld [vmem:[%s3427_s25 + $0x128] sm:$0xf] }
  0xbf   : > { %v946_v9 = vpop.f32.mrf.mxu2  ;;  %3063 = vtanh.f32 %v3647_v8  ;;  %v3651_v10 = vpop.f32.mrf.mxu3 }
  0xc0   : > { %v768_v13 = vpop.f32.mrf.mxu0 }
  0xc1   : > { %v769_v11 = vadd.f32 %v3612_v27, %v768_v13  ;;  %v857_v15 = vpop.f32.mrf.mxu1 }
  0xc3   : > { %v858_v14 = vadd.f32 %v857_v15, %v769_v11  ;;  %v3719_v24 = vpop.permute.xlu2 %1745 }
  0xc4   : > { %2918 = vmatmul.msk.bf16.gmra.mxu2 %vm699_vm1, %v2767_v12  ;;  %5140 = vst [vmem:[#allocation2_spill] sm:$0xff] %v3719_v24 }
  0xc5   : > { %v3064_v21 = vpop.eup %3063  ;;  %v3660_v17 = vadd.f32 %v946_v9, %v858_v14  ;;  %v2996_v9 = vld [vmem:[%s3427_s25 + $0x130] sm:$0xf0]  ;;  %v3714_v18 = vpop.permute.xlu1 %1737  ;;  %s3325_s25 = smov 64  }
  0xc6   : > { %1887 = vrot.lane.b32.xlu1 %v3064_v21, %s3324_s19  ;;  %v2791_v14 = vor.u32 %v2996_v9, %v2790_v7  ;;  %v3717_v23 = vpop.permute.xlu0 %1741 }
  0xc7   : > { %v949_v26 = vpop.f32.mrf.mxu2  ;;  %3065 = vtanh.f32 %v3660_v17  ;;  %v3669_v28 = vpop.f32.mrf.mxu3 }
  0xc8   : > { %v771_v30 = vpop.f32.mrf.mxu0 }
  0xc9   : > { %v772_v33 = vadd.f32 %v3612_v27, %v771_v30  ;;  %v860_v34 = vpop.f32.mrf.mxu1 }
  0xcb   : > { %v861_v35 = vadd.f32 %v860_v34, %v772_v33  ;;  %810 = vmatmul.bf16.gmra.mxu0 %v2759_v29 }
  0xcc   : > { %899 = vmatmul.bf16.gmra.mxu1 %v2763_v31  ;;  %2923 = vmatmul.msk.bf16.gmra.mxu3 %vm699_vm1, %v2827_v32 }
  0xcd   : > { %v3066_v39 = vpop.eup %3065  ;;  %v3677_v40 = vadd.f32 %v949_v26, %v861_v35  ;;  %v3729_v35 = vpop.permute.xlu1 %1743 }
  0xce   : > { %1889 = vrot.lane.b32.xlu2 %v3066_v39, %s3324_s19  ;;  %v3731_v37 = vpop.permute.xlu0 %1747 }
  0xcf   : > { %v951_v42 = vpop.f32.mrf.mxu2  ;;  %3067 = vtanh.f32 %v3677_v40  ;;  %v3683_v43 = vpop.f32.mrf.mxu3  ;;  %5141 = vst [vmem:[#allocation3_spill] sm:$0xff] %v3731_v37 }
  0xd0   : > { %v773_v48 = vpop.f32.mrf.mxu0 }
  0xd1   : > { %v774_v49 = vadd.f32 %v3612_v27, %v773_v48  ;;  %v862_v50 = vpop.f32.mrf.mxu1  ;;  %v822_v48 = vadd.f32 %v3612_v27, %v3627_v46  ;;  %v824_v46 = vadd.f32 %v3612_v27, %v3641_v61 }
  0xd3   : > { %v863_v51 = vadd.f32 %v862_v50, %v774_v49 }
  0xd4   : > { %2919 = vmatmul.msk.bf16.gmra.mxu2 %vm699_vm1, %v2779_v47 }
  0xd5   : > { %v3068_v54 = vpop.eup %3067  ;;  %v3691_v55 = vadd.f32 %v951_v42, %v863_v51  ;;  %v3733_v42 = vpop.permute.xlu2 %1751 }
  0xd6   : > { %1891 = vrot.lane.b32.xlu0 %v3068_v54, %s3324_s19  ;;  %5142 = vst [vmem:[#allocation4_spill] sm:$0xff] %v3733_v42  ;;  %v3744_v58 = vpop.permute.xlu1 %1749 }
  0xd7   : > { %v954_v59 = vpop.f32.mrf.mxu2  ;;  %3069 = vtanh.f32 %v3691_v55  ;;  %v3699_v62 = vpop.f32.mrf.mxu3  ;;  %5143 = vst [vmem:[#allocation5_spill] sm:$0xff] %v3744_v58 }
  0xd8   : > { %v776_v1 = vpop.f32.mrf.mxu0 }
  0xd9   : > { %v777_v4 = vadd.f32 %v3612_v27, %v776_v1  ;;  %v865_v5 = vpop.f32.mrf.mxu1  ;;  %v3748_v1 = vpop.permute.xlu0 %1753 }
  0xda   : > { %5144 = vst [vmem:[#allocation6_spill] sm:$0xff] %v3748_v1 }
  0xdb   : > { %v866_v6 = vadd.f32 %v865_v5, %v777_v4  ;;  %815 = vmatmul.bf16.gmra.mxu0 %v2771_v63 }
  0xdc   : > { %904 = vmatmul.bf16.gmra.mxu1 %v2775_v2 }
  0xdd   : > { %v3070_v12 = vpop.eup %3069  ;;  %v3708_v13 = vadd.f32 %v954_v59, %v866_v6  ;;  %v3753_v4 = vpop.permute.xlu2 %1757 }
  0xde   : > { %1893 = vrot.lane.b32.xlu1 %v3070_v12, %s3324_s19  ;;  %5145 = vst [vmem:[#allocation7_spill] sm:$0xff] %v3753_v4 }
  0xdf   : > { %v956_v11 = vpop.f32.mrf.mxu2  ;;  %3071 = vtanh.f32 %v3708_v13  ;;  %v3712_v15 = vpop.f32.mrf.mxu3 }
  0xe0   : > { %v778_v19 = vpop.f32.mrf.mxu0 }
  0xe1   : > { %v779_v20 = vadd.f32 %v3612_v27, %v778_v19  ;;  %v867_v21 = vpop.f32.mrf.mxu1  ;;  %v2924_v19 = vmul.f32 -1.442695, %v3624_v44 }
  0xe3   : > { %v868_v25 = vadd.f32 %v867_v21, %v779_v20  ;;  %v3760_v20 = vpop.permute.xlu1 %1755 }
  0xe4   : > { %2920 = vmatmul.msk.bf16.gmra.mxu2 %vm699_vm1, %v2791_v14  ;;  %5146 = vst [vmem:[#allocation8_spill] sm:$0xff] %v3760_v20 }
  0xe5   : > { %v3072_v26 = vpop.eup %3071  ;;  %v3722_v29 = vadd.f32 %v956_v11, %v868_v25 }
  0xe6   : > { %1895 = vrot.lane.b32.xlu2 %v3072_v26, %s3324_s19  ;;  %v3767_v26 = vpop.permute.xlu0 %1759 }
  0xe7   : > { %v959_v30 = vpop.f32.mrf.mxu2  ;;  %3073 = vtanh.f32 %v3722_v29  ;;  %v3726_v31 = vpop.f32.mrf.mxu3  ;;  %5147 = vst [vmem:[#allocation9_spill] sm:$0xff] %v3767_v26 }
  0xe8   : > { %v781_v32 = vpop.f32.mrf.mxu0 }
  0xe9   : > { %v782_v33 = vadd.f32 %v3612_v27, %v781_v32  ;;  %v870_v34 = vpop.f32.mrf.mxu1  ;;  %v3770_v32 = vpop.permute.xlu2 %1763 }
  0xea   : > { %5148 = vst [vmem:[#allocation10_spill] sm:$0xff] %v3770_v32 }
  0xeb   : > { %v871_v36 = vadd.f32 %v870_v34, %v782_v33 }
  0xed   : > { %v3074_v39 = vpop.eup %3073  ;;  %v3735_v47 = vadd.f32 %v959_v30, %v871_v36  ;;  %v2925_v36 = vmul.f32 -1.442695, %v3634_v56 }
  0xee   : > { %1897 = vrot.lane.b32.xlu0 %v3074_v39, %s3324_s19 }
  0xef   : > { %v961_v49 = vpop.f32.mrf.mxu2  ;;  %3075 = vtanh.f32 %v3735_v47  ;;  %v910_v50 = vpop.f32.mrf.mxu3 }
  0xf0   : > { %v3741_v51 = vadd.f32 %v910_v50, %v822_v48  ;;  %v783_v52 = vpop.f32.mrf.mxu0 }
  0xf1   : > { %v784_v53 = vadd.f32 %v3612_v27, %v783_v52  ;;  %v872_v54 = vpop.f32.mrf.mxu1 }
  0xf3   : > { %v873_v57 = vadd.f32 %v872_v54, %v784_v53  ;;  %v3780_v53 = vpop.permute.xlu1 %1761 }
  0xf4   : > { %5149 = vst [vmem:[#allocation11_spill] sm:$0xff] %v3780_v53 }
  0xf5   : > { %v3076_v59 = vpop.eup %3075  ;;  %v3746_v63 = vadd.f32 %v961_v49, %v873_v57 }
  0xf6   : > { %1899 = vrot.lane.b32.xlu1 %v3076_v59, %s3324_s19 }
  0xf7   : > { %v964_v2 = vpop.f32.mrf.mxu2  ;;  %3077 = vtanh.f32 %v3746_v63  ;;  %v912_v5 = vpop.f32.mrf.mxu3 }
  0xf8   : > { %v3756_v6 = vadd.f32 %v912_v5, %v824_v46  ;;  %v786_v7 = vpop.f32.mrf.mxu0  ;;  %v3783_v46 = vpop.permute.xlu0 %1765 }
  0xf9   : > { %v875_v9 = vpop.f32.mrf.mxu1  ;;  %v787_v12 = vadd.f32 %v3612_v27, %v786_v7  ;;  %5150 = vst [vmem:[#allocation12_spill] sm:$0xff] %v3783_v46 }
  0xfb   : > { %v876_v11 = vadd.f32 %v875_v9, %v787_v12  ;;  %v2926_v9 = vmul.f32 -1.442695, %v3647_v8 }
  0xfd   : > { %v3078_v14 = vpop.eup %3077  ;;  %v3762_v61 = vadd.f32 %v964_v2, %v876_v11  ;;  %v3787_v2 = vpop.permute.xlu2 %1769 }
  0xfe   : > { %1901 = vrot.lane.b32.xlu2 %v3078_v14, %s3324_s19  ;;  %5151 = vst [vmem:[#allocation13_spill] sm:$0xff] %v3787_v2 }
  0xff   : > { %v966_v21 = vpop.f32.mrf.mxu2  ;;  %v3765_v25 = vpop.f32.mrf.mxu3  ;;  %3079 = vtanh.f32 %v3762_v61 }
 0x100   : > { %v788_v30 = vpop.f32.mrf.mxu0  ;;  %3081 = vpow2.f32 %v2924_v19 }
 0x101   : > { %v789_v33 = vadd.f32 %v3612_v27, %v788_v30  ;;  %v877_v44 = vpop.f32.mrf.mxu1 }
 0x103   : > { %v878_v34 = vadd.f32 %v877_v44, %v789_v33  ;;  %v3798_v44 = vpop.permute.xlu1 %1767 }
 0x104   : > { %5152 = vst [vmem:[#allocation14_spill] sm:$0xff] %v3798_v44 }
 0x105   : > { %v3774_v39 = vadd.f32 %v966_v21, %v878_v34  ;;  %v3080_v48 = vpop.eup %3079 }
 0x106   : > { %v3082_v50 = vpop.eup %3081  ;;  %1903 = vrot.lane.b32.xlu0 %v3080_v48, %s3324_s19 }
 0x107   : > { %v969_v49 = vpop.f32.mrf.mxu2  ;;  %3083 = vtanh.f32 %v3774_v39  ;;  %v3777_v52 = vpop.f32.mrf.mxu3  ;;  %v3785_v56 = vadd.f32 1.0, %v3082_v50 }
 0x108   : > { %v791_v54 = vpop.f32.mrf.mxu0  ;;  %3085 = vpow2.f32 %v2925_v36  ;;  %v3802_v36 = vpop.permute.xlu0 %1771 }
 0x109   : > { %v792_v57 = vadd.f32 %v3612_v27, %v791_v54  ;;  %v880_v59 = vpop.f32.mrf.mxu1  ;;  %3087 = vrcp.f32 %v3785_v56  ;;  %5153 = vst [vmem:[#allocation15_spill] sm:$0xff] %v3802_v36  ;;  %v3806_v50 = vpop.permute.xlu2 %1775  ;;  %vm1152_vm3 = vweird.f32 %v3785_v56 }
 0x10a   : > { %5154 = vst [vmem:[#allocation16_spill] sm:$0xff] %v3806_v50 }
 0x10b   : > { %v881_v5 = vadd.f32 %v880_v59, %v792_v57  ;;  %v3821_v2 = vpop.permute.xlu1 %1773 }
 0x10c   : > { %5155 = vst [vmem:[#allocation17_spill] sm:$0xff] %v3821_v2 }
 0x10d   : > { %v3084_v7 = vpop.eup %3083  ;;  %v3790_v12 = vadd.f32 %v969_v49, %v881_v5 }
 0x10e   : > { %1905 = vrot.lane.b32.xlu1 %v3084_v7, %s3324_s19  ;;  %v3086_v14 = vpop.eup %3085 }
 0x10f   : > { %v971_v11 = vpop.f32.mrf.mxu2  ;;  %3089 = vtanh.f32 %v3790_v12  ;;  %v3795_v19 = vpop.f32.mrf.mxu3  ;;  %v3800_v8 = vadd.f32 1.0, %v3086_v14  ;;  %v2927_v14 = vmul.f32 -1.442695, %v3660_v17 }
 0x110   : > { %v793_v21 = vpop.f32.mrf.mxu0  ;;  %3091 = vpow2.f32 %v2926_v9  ;;  %v3804_v48 = vpop.eup %3087 }
 0x111   : > { %v794_v30 = vadd.f32 %v3612_v27, %v793_v21  ;;  %v882_v33 = vpop.f32.mrf.mxu1  ;;  %3093 = vrcp.f32 %v3800_v8  ;;  %v1148_v5 = vmul.f32 %v3804_v48, %v3785_v56  ;;  %v3827_v44 = vpop.permute.xlu0 %1777  ;;  %vm1153_vm2 = vweird.f32 %v3804_v48 }
 0x112   : > { %5156 = vst [vmem:[#allocation18_spill] sm:$0xff] %v3827_v44  ;;  %vm3854_vm4 = vmor %vm1152_vm3, %vm1153_vm2  ;;  %vm1167_vm7 = vweird.f32 %v3800_v8 }
 0x113   : > { %v883_v34 = vadd.f32 %v882_v33, %v794_v30  ;;  %v1149_v33 = vsub.f32 1.0, %v1148_v5 }
 0x115   : > { %v3090_v49 = vpop.eup %3089  ;;  %v3808_v54 = vadd.f32 %v971_v11, %v883_v34 }
 0x116   : > { %1907 = vrot.lane.b32.xlu2 %v3090_v49, %s3324_s19  ;;  %v3092_v59 = vpop.eup %3091 }
 0x117   : > { %v974_v57 = vpop.f32.mrf.mxu2  ;;  %3095 = vtanh.f32 %v3808_v54  ;;  %v3815_v7 = vpop.f32.mrf.mxu3  ;;  %v3819_v30 = vadd.f32 1.0, %v3092_v59  ;;  %v1150_v59 = vmul.f32 %v3804_v48, %v1149_v33 }
 0x118   : > { %v796_v9 = vpop.f32.mrf.mxu0  ;;  %v3823_v49 = vpop.eup %3093  ;;  %3097 = vpow2.f32 %v2927_v14  ;;  %v2928_v14 = vmul.f32 -1.442695, %v3677_v40  ;;  %v1156_v40 = vand.u32 2147483647, %v3785_v56 }
 0x119   : > { %v797_v21 = vadd.f32 %v3612_v27, %v796_v9  ;;  %v885_v11 = vpop.f32.mrf.mxu1  ;;  %3099 = vrcp.f32 %v3819_v30  ;;  %v1163_v5 = vmul.f32 %v3823_v49, %v3800_v8  ;;  %v3834_v9 = vpop.permute.xlu2 %1781  ;;  %vm1168_vm6 = vweird.f32 %v3823_v49 }
 0x11a   : > { %5157 = vst [vmem:[#allocation19_spill] sm:$0xff] %v3834_v9  ;;  %v1158_v9 = vand.u32 2147483648, %v3785_v56  ;;  %vm1157_vm5 = vcmp.eq.f32.partialorder %v1156_v40, 8.507059e+37  ;;  %v1173_v40 = vand.u32 2147483648, %v3800_v8  ;;  %vm3887_vm8 = vmor %vm1167_vm7, %vm1168_vm6  ;;  %vm1182_vm11 = vweird.f32 %v3819_v30 }
 0x11b   : > { %v886_v34 = vadd.f32 %v885_v11, %v797_v21  ;;  %v1164_v33 = vsub.f32 1.0, %v1163_v5 }
 0x11d   : > { %v3096_v32 = vpop.eup %3095  ;;  %v3825_v36 = vadd.f32 %v974_v57, %v886_v34 }
 0x11e   : > { %1909 = vrot.lane.b32.xlu0 %v3096_v32, %s3324_s19  ;;  %v3098_v2 = vpop.eup %3097  ;;  %v1151_v32 = vadd.f32 %v3804_v48, %v1150_v59 }
 0x11f   : > { %v976_v17 = vpop.f32.mrf.mxu2  ;;  %3101 = vtanh.f32 %v3825_v36  ;;  %v3837_v21 = vpop.f32.mrf.mxu3  ;;  %v3852_v26 = vadd.f32 1.0, %v3098_v2 }
 0x120   : > { %v798_v57 = vpop.f32.mrf.mxu0  ;;  %v3843_v4 = vpop.eup %3099  ;;  %3103 = vpow2.f32 %v2928_v14  ;;  %v1155_v14 = vsel %vm3854_vm4, %v3804_v48, %v1151_v32 }
 0x121   : > { %v799_v11 = vadd.f32 %v3612_v27, %v798_v57  ;;  %v887_v34 = vpop.f32.mrf.mxu1  ;;  %v3850_v57 = vpop.permute.xlu1 %1779  ;;  %vm1183_vm10 = vweird.f32 %v3843_v4  ;;  %vm1197_vm15 = vweird.f32 %v3852_v26 }
 0x122   : > { %5158 = vst [vmem:[#allocation20_spill] sm:$0xff] %v3850_v57  ;;  %v3867_v2 = vpop.permute.xlu0 %1783  ;;  %vm3929_vm12 = vmor %vm1182_vm11, %vm1183_vm10 }
 0x123   : > { %v888_v46 = vadd.f32 %v887_v34, %v799_v11  ;;  %v2929_v11 = vmul.f32 -1.442695, %v3691_v55  ;;  %5161 = vst [vmem:[#allocation21_spill] sm:$0xff] %v3867_v2  ;;  %v1178_v34 = vmul.f32 %v3843_v4, %v3819_v30  ;;  %v827_v2 = vadd.f32 %v3612_v27, %v3651_v10 }
 0x125   : > { %v3102_v50 = vpop.eup %3101  ;;  %v3848_v53 = vadd.f32 %v976_v17, %v888_v46  ;;  %v1165_v46 = vmul.f32 %v3823_v49, %v1164_v33  ;;  %v1159_v17 = vor.u32 1.1754944e-38, %v1158_v9  ;;  %v1179_v44 = vsub.f32 1.0, %v1178_v34 }
 0x126   : > { %1911 = vrot.lane.b32.xlu1 %v3102_v50, %s3324_s19  ;;  %v1884_v50 = vpop.permute.xlu2 %1883  ;;  %v3104_v32 = vpop.eup %3103  ;;  %v916_v10 = vadd.f32 %v3765_v25, %v827_v2 }
 0x127   : > { %v979_v5 = vpop.f32.mrf.mxu2  ;;  %3105 = vtanh.f32 %v3848_v53  ;;  %v3865_v56 = vpop.f32.mrf.mxu3  ;;  %v3873_v55 = vsel %vm1157_vm5, %v1159_v17, %v1155_v14  ;;  %v1166_v33 = vadd.f32 %v3823_v49, %v1165_v46  ;;  %v1171_v14 = vand.u32 2147483647, %v3800_v8 }
 0x128   : > { %v801_v57 = vpop.f32.mrf.mxu0  ;;  %3107 = vrcp.f32 %v3852_v26 }
 0x129   : > { %v802_v59 = vadd.f32 %v3612_v27, %v801_v57  ;;  %v890_v48 = vpop.f32.mrf.mxu1  ;;  %3109 = vpow2.f32 %v2929_v11  ;;  %v1979_v57 = vmul.f32 %v1884_v50, %v3873_v55  ;;  %v3885_v11 = vadd.f32 1.0, %v3104_v32 }
 0x12a   : > { %v1170_v34 = vsel %vm3887_vm8, %v3823_v49, %v1166_v33  ;;  %v1180_v32 = vmul.f32 %v3843_v4, %v1179_v44  ;;  %vm1172_vm9 = vcmp.eq.f32.partialorder %v1171_v14, 8.507059e+37  ;;  %v829_v49 = vadd.f32 %v3612_v27, %v3669_v28 }
 0x12b   : > { %v891_v9 = vadd.f32 %v890_v48, %v802_v59  ;;  %v1174_v48 = vor.u32 1.1754944e-38, %v1173_v40  ;;  %v2930_v40 = vmul.f32 -1.442695, %v3708_v13  ;;  %v1186_v13 = vand.u32 2147483647, %v3819_v30 }
 0x12c   : > { %vm1212_vm3 = vweird.f32 %v3885_v11 }
 0x12d   : > { %v3106_v42 = vpop.eup %3105  ;;  %v3883_v17 = vadd.f32 %v979_v5, %v891_v9  ;;  %v3898_v5 = vpop.permute.xlu1 %1785  ;;  %v3909_v33 = vsel %vm1172_vm9, %v1174_v48, %v1170_v34  ;;  %v1188_v34 = vand.u32 2147483648, %v3819_v30  ;;  %v2931_v48 = vmul.f32 -1.442695, %v3722_v29 }
 0x12e   : > { %1913 = vrot.lane.b32.xlu2 %v3106_v42, %s3324_s19  ;;  %2043 = vrot.lane.b32.xlu1 %v1979_v57, %s3324_s19  ;;  %5164 = vst [vmem:[#allocation22_spill] sm:$0xff] %v3898_v5  ;;  %v3900_v50 = vpop.eup %3107  ;;  %v918_v5 = vadd.f32 %v3777_v52, %v829_v49  ;;  %vm1187_vm13 = vcmp.eq.f32.partialorder %v1186_v13, 8.507059e+37 }
 0x12f   : > { %v981_v59 = vpop.f32.mrf.mxu2  ;;  %3111 = vtanh.f32 %v3883_v17  ;;  %v1004_v8 = vpop.f32.mrf.mxu3  ;;  %v1193_v44 = vmul.f32 %v3900_v50, %v3852_v26  ;;  %vm1198_vm14 = vweird.f32 %v3900_v50 }
 0x130   : > { %v3903_v25 = vadd.f32 %v1004_v8, %v916_v10  ;;  %v803_v2 = vpop.f32.mrf.mxu0  ;;  %v3110_v42 = vpop.eup %3109  ;;  %3113 = vrcp.f32 %v3885_v11  ;;  %v1181_v8 = vadd.f32 %v3843_v4, %v1180_v32  ;;  %vm3970_vm0 = vmor %vm1197_vm15, %vm1198_vm14 }
 0x131   : > { %v804_v9 = vadd.f32 %v3612_v27, %v803_v2  ;;  %v892_v57 = vpop.f32.mrf.mxu1  ;;  %v1886_v46 = vpop.permute.xlu0 %1885  ;;  %v3915_v14 = vadd.f32 1.0, %v3110_v42 }
 0x132   : > { %3115 = vtanh.f32 %v3903_v25  ;;  %v1980_v28 = vmul.f32 %v1886_v46, %v3909_v33  ;;  %v1185_v52 = vsel %vm3929_vm12, %v3843_v4, %v1181_v8 }
 0x133   : > { %v893_v10 = vadd.f32 %v892_v57, %v804_v9  ;;  %3117 = vpow2.f32 %v2930_v40  ;;  %v1194_v57 = vsub.f32 1.0, %v1193_v44  ;;  %vm1227_vm7 = vweird.f32 %v3915_v14 }
 0x134   : > { %3119 = vrcp.f32 %v3915_v14 }
 0x135   : > { %v3112_v2 = vpop.eup %3111  ;;  %v3925_v9 = vadd.f32 %v981_v59, %v893_v10  ;;  %v1189_v10 = vor.u32 1.1754944e-38, %v1188_v34  ;;  %3121 = vpow2.f32 %v2931_v48  ;;  %v1195_v32 = vmul.f32 %v3900_v50, %v1194_v57 }
 0x136   : > { %1915 = vrot.lane.b32.xlu0 %v3112_v2, %s3324_s19  ;;  %2045 = vrot.lane.b32.xlu2 %v1980_v28, %s3324_s19  ;;  %v3933_v46 = vpop.eup %3113 }
 0x137   : > { %v984_v42 = vpop.f32.mrf.mxu2  ;;  %v1006_v29 = vpop.f32.mrf.mxu3  ;;  %3123 = vtanh.f32 %v3925_v9  ;;  %v3944_v44 = vsel %vm1187_vm13, %v1189_v10, %v1185_v52  ;;  %v1208_v34 = vmul.f32 %v3933_v46, %v3885_v11  ;;  %v2932_v52 = vmul.f32 -1.442695, %v3735_v47 }
 0x138   : > { %v3939_v30 = vadd.f32 %v1006_v29, %v918_v5  ;;  %v806_v59 = vpop.f32.mrf.mxu0  ;;  %v3116_v49 = vpop.eup %3115  ;;  %v832_v5 = vadd.f32 %v3612_v27, %v3683_v43  ;;  %v1196_v43 = vadd.f32 %v3900_v50, %v1195_v32  ;;  %v1203_v47 = vand.u32 2147483648, %v3852_v26 }
 0x139   : > { %v807_v40 = vadd.f32 %v3612_v27, %v806_v59  ;;  %v895_v28 = vpop.f32.mrf.mxu1  ;;  %v1888_v2 = vpop.permute.xlu1 %1887  ;;  %1935 = vrot.lane.b32.xlu1 %v3116_v49, %s3324_s19  ;;  %vm1213_vm2 = vweird.f32 %v3933_v46 }
 0x13a   : > { %3125 = vtanh.f32 %v3939_v30  ;;  %v1981_v8 = vmul.f32 %v1888_v2, %v3944_v44  ;;  %v3118_v48 = vpop.eup %3117  ;;  %v921_v57 = vadd.f32 %v3795_v19, %v832_v5  ;;  %vm4015_vm4 = vmor %vm1212_vm3, %vm1213_vm2 }
 0x13b   : > { %v896_v4 = vadd.f32 %v895_v28, %v807_v40  ;;  %v3955_v29 = vpop.eup %3119  ;;  %v3962_v28 = vadd.f32 1.0, %v3118_v48  ;;  %v1200_v48 = vsel %vm3970_vm0, %v3900_v50, %v1196_v43 }
 0x13c   : > { %v3122_v49 = vpop.eup %3121  ;;  %vm1228_vm6 = vweird.f32 %v3955_v29 }
 0x13d   : > { %v3953_v13 = vadd.f32 %v984_v42, %v896_v4  ;;  %v3124_v40 = vpop.eup %3123  ;;  %v1209_v4 = vsub.f32 1.0, %v1208_v34  ;;  %v834_v34 = vadd.f32 %v3612_v27, %v3699_v62  ;;  %vm4056_vm8 = vmor %vm1227_vm7, %vm1228_vm6  ;;  %vm1242_vm10 = vweird.f32 %v3962_v28 }
 0x13e   : > { %2047 = vrot.lane.b32.xlu0 %v1981_v8, %s3324_s19  ;;  %v1201_v8 = vand.u32 2147483647, %v3852_v26 }
 0x13f   : > { %v986_v59 = vpop.f32.mrf.mxu2  ;;  %v1009_v10 = vpop.f32.mrf.mxu3  ;;  %3127 = vtanh.f32 %v3953_v13  ;;  %v1210_v26 = vmul.f32 %v3933_v46, %v1209_v4  ;;  %v923_v62 = vadd.f32 %v3815_v7, %v834_v34 }
 0x140   : > { %v3964_v42 = vadd.f32 %v1009_v10, %v921_v57  ;;  %v808_v2 = vpop.f32.mrf.mxu0  ;;  %v3126_v20 = vpop.eup %3125  ;;  %3129 = vpow2.f32 %v2932_v52  ;;  %v3984_v10 = vadd.f32 1.0, %v3122_v49  ;;  %v1204_v52 = vor.u32 1.1754944e-38, %v1203_v47 }
 0x141   : > { %v809_v19 = vadd.f32 %v3612_v27, %v808_v2  ;;  %v897_v32 = vpop.f32.mrf.mxu1  ;;  %1937 = vrot.lane.b32.xlu2 %v3126_v20, %s3324_s19  ;;  %1917 = vrot.lane.b32.xlu1 %v3124_v40, %s3324_s19  ;;  %v1223_v20 = vmul.f32 %v3955_v29, %v3915_v14  ;;  %v2933_v40 = vmul.f32 -1.442695, %v3746_v63  ;;  %vm1202_vm1 = vcmp.eq.f32.partialorder %v1201_v8, 8.507059e+37  ;;  %v1890_v2 = vpop.permute.xlu2 %1889 }
 0x142   : > { %3131 = vtanh.f32 %v3964_v42  ;;  %v1211_v63 = vadd.f32 %v3933_v46, %v1210_v26  ;;  %v1216_v26 = vand.u32 2147483647, %v3885_v11  ;;  %vm1257_vm15 = vweird.f32 %v3984_v10 }
 0x143   : > { %v898_v57 = vadd.f32 %v897_v32, %v809_v19  ;;  %3133 = vrcp.f32 %v3962_v28  ;;  %v3993_v32 = vsel %vm1202_vm1, %v1204_v52, %v1200_v48  ;;  %v1224_v8 = vsub.f32 1.0, %v1223_v20 }
 0x144   : > { %3135 = vrcp.f32 %v3984_v10  ;;  %vm1217_vm5 = vcmp.eq.f32.partialorder %v1216_v26, 8.507059e+37 }
 0x145   : > { %v3991_v50 = vadd.f32 %v986_v59, %v898_v57  ;;  %v3128_v19 = vpop.eup %3127  ;;  %3137 = vpow2.f32 %v2933_v40  ;;  %v1982_v59 = vmul.f32 %v1890_v2, %v3993_v32  ;;  %v1218_v57 = vand.u32 2147483648, %v3885_v11 }
 0x146   : > { %v3130_v4 = vpop.eup %3129  ;;  %v837_v2 = vadd.f32 %v3612_v27, %v3712_v15  ;;  %v2934_v11 = vmul.f32 -1.442695, %v3762_v61 }
 0x147   : > { %v989_v43 = vpop.f32.mrf.mxu2  ;;  %v1011_v49 = vpop.f32.mrf.mxu3  ;;  %3139 = vtanh.f32 %v3991_v50  ;;  %v4010_v20 = vadd.f32 1.0, %v3130_v4 }
 0x148   : > { %v3997_v5 = vadd.f32 %v1011_v49, %v923_v62  ;;  %v811_v47 = vpop.f32.mrf.mxu0  ;;  %v3132_v7 = vpop.eup %3131  ;;  %v1225_v49 = vmul.f32 %v3955_v29, %v1224_v8 }
 0x149   : > { %v812_v34 = vadd.f32 %v3612_v27, %v811_v47  ;;  %v900_v48 = vpop.f32.mrf.mxu1  ;;  %v4003_v52 = vpop.eup %3133  ;;  %1939 = vrot.lane.b32.xlu0 %v3132_v7, %s3324_s19  ;;  %1919 = vrot.lane.b32.xlu2 %v3128_v19, %s3324_s19  ;;  %v1215_v19 = vsel %vm4015_vm4, %v3933_v46, %v1211_v63  ;;  %v2936_v47 = vmul.f32 -1.442695, %v3790_v12  ;;  %v1219_v7 = vor.u32 1.1754944e-38, %v1218_v57 }
 0x14a   : > { %3141 = vtanh.f32 %v3997_v5  ;;  %2049 = vrot.lane.b32.xlu1 %v1982_v59, %s3324_s19  ;;  %v1238_v4 = vmul.f32 %v4003_v52, %v3962_v28  ;;  %v926_v59 = vadd.f32 %v3837_v21, %v837_v2  ;;  %v1226_v21 = vadd.f32 %v3955_v29, %v1225_v49 }
 0x14b   : > { %v901_v40 = vadd.f32 %v900_v48, %v812_v34  ;;  %v1892_v34 = vpop.permute.xlu0 %1891  ;;  %v4030_v48 = vpop.eup %3135  ;;  %3143 = vrcp.f32 %v4010_v20  ;;  %v4036_v46 = vsel %vm1217_vm5, %v1219_v7, %v1215_v19  ;;  %v1233_v19 = vand.u32 2147483648, %v3915_v14 }
 0x14c   : > { %v3138_v1 = vpop.eup %3137  ;;  %3145 = vpow2.f32 %v2934_v11  ;;  %v1983_v12 = vmul.f32 %v1892_v34, %v4036_v46  ;;  %v1239_v26 = vsub.f32 1.0, %v1238_v4  ;;  %v1231_v11 = vand.u32 2147483647, %v3915_v14 }
 0x14d   : > { %v4033_v15 = vadd.f32 %v989_v43, %v901_v40  ;;  %v3140_v8 = vpop.eup %3139  ;;  %3147 = vpow2.f32 %v2936_v47  ;;  %v4045_v7 = vadd.f32 1.0, %v3138_v1  ;;  %v2935_v49 = vmul.f32 -1.442695, %v3774_v39 }
 0x14e   : > { %v839_v14 = vadd.f32 %v3612_v27, %v3726_v31  ;;  %v1253_v47 = vmul.f32 %v4030_v48, %v3984_v10  ;;  %v1230_v39 = vsel %vm4056_vm8, %v3955_v29, %v1226_v21  ;;  %vm1232_vm9 = vcmp.eq.f32.partialorder %v1231_v11, 8.507059e+37  ;;  %v3315_v11 = vld [vmem:[%s5133_s2] ss:$0 sm:$0xff] }
 0x14f   : > { %v991_v61 = vpop.f32.mrf.mxu2  ;;  %v1014_v63 = vpop.f32.mrf.mxu3  ;;  %3149 = vtanh.f32 %v4033_v15  ;;  %vm1243_vm11 = vweird.f32 %v4003_v52  ;;  %vm1258_vm14 = vweird.f32 %v4030_v48  ;;  %vm1272_vm3 = vweird.f32 %v4010_v20 }
 0x150   : > { %v4040_v57 = vadd.f32 %v1014_v63, %v926_v59  ;;  %v813_v62 = vpop.f32.mrf.mxu0  ;;  %v3142_v43 = vpop.eup %3141  ;;  %v1240_v59 = vmul.f32 %v4003_v52, %v1239_v26  ;;  %v1234_v63 = vor.u32 1.1754944e-38, %v1233_v19  ;;  %v1254_v26 = vsub.f32 1.0, %v1253_v47  ;;  %vm4106_vm12 = vmor %vm1242_vm10, %vm1243_vm11 }
 0x151   : > { %v814_v40 = vadd.f32 %v3612_v27, %v813_v62  ;;  %v902_v2 = vpop.f32.mrf.mxu1  ;;  %1921 = vrot.lane.b32.xlu0 %v3140_v8, %s3324_s19  ;;  %2051 = vrot.lane.b32.xlu2 %v1983_v12, %s3324_s19  ;;  %v4068_v34 = vpop.eup %3143  ;;  %v928_v62 = vadd.f32 %v3865_v56, %v839_v14  ;;  %v1246_v14 = vand.u32 2147483647, %v3962_v28  ;;  %v1248_v47 = vand.u32 2147483648, %v3962_v28  ;;  %vm4138_vm0 = vmor %vm1257_vm15, %vm1258_vm14 }
 0x152   : > { %3151 = vtanh.f32 %v4040_v57  ;;  %1941 = vrot.lane.b32.xlu1 %v3142_v43, %s3324_s19  ;;  %v1894_v8 = vpop.permute.xlu1 %1893  ;;  %v3146_v12 = vpop.eup %3145  ;;  %v1241_v56 = vadd.f32 %v4003_v52, %v1240_v59  ;;  %vm1273_vm2 = vweird.f32 %v4068_v34  ;;  %vm1287_vm6 = vweird.f32 %v4045_v7 }
 0x153   : > { %v903_v4 = vadd.f32 %v902_v2, %v814_v40  ;;  %3153 = vrcp.f32 %v4045_v7  ;;  %v3148_v31 = vpop.eup %3147  ;;  %v4075_v40 = vsel %vm1232_vm9, %v1234_v63, %v1230_v39  ;;  %v2939_v39 = vmul.f32 -1.442695, %v3848_v53  ;;  %vm4180_vm5 = vmor %vm1272_vm3, %vm1273_vm2 }
 0x154   : > { %3155 = vpow2.f32 %v2935_v49  ;;  %v1984_v2 = vmul.f32 %v1894_v8, %v4075_v40  ;;  %v4094_v59 = vadd.f32 1.0, %v3148_v31  ;;  %v1268_v8 = vmul.f32 %v4068_v34, %v4010_v20 }
 0x155   : > { %v4073_v43 = vadd.f32 %v991_v61, %v903_v4  ;;  %v3150_v21 = vpop.eup %3149  ;;  %v4083_v61 = vadd.f32 1.0, %v3146_v12  ;;  %v1245_v31 = vsel %vm4106_vm12, %v4003_v52, %v1241_v56  ;;  %vm1247_vm13 = vcmp.eq.f32.partialorder %v1246_v14, 8.507059e+37 }
 0x156   : > { %v1269_v28 = vsub.f32 1.0, %v1268_v8  ;;  %v1261_v8 = vand.u32 2147483647, %v3984_v10  ;;  %v2937_v53 = vmul.f32 -1.442695, %v3808_v54  ;;  %vm1332_vm14 = vweird.f32 %v4094_v59 }
 0x157   : > { %v994_v27 = vpop.f32.mrf.mxu2  ;;  %v1016_v29 = vpop.f32.mrf.mxu3  ;;  %3157 = vtanh.f32 %v4073_v43  ;;  %vm1302_vm10 = vweird.f32 %v4083_v61 }
 0x158   : > { %v4079_v19 = vadd.f32 %v1016_v29, %v928_v62  ;;  %v816_v1 = vpop.f32.mrf.mxu0  ;;  %v3152_v24 = vpop.eup %3151  ;;  %vm1262_vm1 = vcmp.eq.f32.partialorder %v1261_v8, 8.507059e+37 }
 0x159   : > { %v817_v49 = vadd.f32 %v3315_v11, %v816_v1  ;;  %v905_v4 = vpop.f32.mrf.mxu1  ;;  %2053 = vrot.lane.b32.xlu0 %v1984_v2, %s3324_s19  ;;  %1943 = vrot.lane.b32.xlu2 %v3152_v24, %s3324_s19  ;;  %v4100_v12 = vpop.eup %3153  ;;  %v1255_v24 = vmul.f32 %v4030_v48, %v1254_v26 }
 0x15a   : > { %3159 = vtanh.f32 %v4079_v19  ;;  %1923 = vrot.lane.b32.xlu1 %v3150_v21, %s3324_s19  ;;  %v3156_v62 = vpop.eup %3155  ;;  %v1249_v21 = vor.u32 1.1754944e-38, %v1248_v47  ;;  %v1896_v2 = vpop.permute.xlu2 %1895  ;;  %vm1288_vm4 = vweird.f32 %v4100_v12 }
 0x15b   : > { %v906_v63 = vadd.f32 %v905_v4, %v817_v49  ;;  %3161 = vrcp.f32 %v4083_v61  ;;  %v1256_v4 = vadd.f32 %v4030_v48, %v1255_v24  ;;  %v4122_v52 = vadd.f32 1.0, %v3156_v62  ;;  %vm4198_vm8 = vmor %vm1287_vm6, %vm1288_vm4 }
 0x15c   : > { %3163 = vpow2.f32 %v2939_v39  ;;  %v4119_v49 = vsel %vm1247_vm13, %v1249_v21, %v1245_v31  ;;  %v1263_v39 = vand.u32 2147483648, %v3984_v10  ;;  %v1270_v10 = vmul.f32 %v4068_v34, %v1269_v28 }
 0x15d   : > { %v4115_v29 = vadd.f32 %v994_v27, %v906_v63  ;;  %3165 = vrcp.f32 %v4094_v59  ;;  %v3158_v26 = vpop.eup %3157  ;;  %v1283_v27 = vmul.f32 %v4100_v12, %v4045_v7  ;;  %v1985_v14 = vmul.f32 %v1896_v2, %v4119_v49 }
 0x15e   : > { %v1260_v54 = vsel %vm4138_vm0, %v4030_v48, %v1256_v4  ;;  %v1271_v4 = vadd.f32 %v4068_v34, %v1270_v10  ;;  %v1276_v10 = vand.u32 2147483647, %v4010_v20  ;;  %vm1317_vm3 = vweird.f32 %v4122_v52 }
 0x15f   : > { %v996_v1 = vpop.f32.mrf.mxu2  ;;  %3167 = vtanh.f32 %v4115_v29  ;;  %v1284_v2 = vsub.f32 1.0, %v1283_v27 }
 0x160   : > { %v818_v56 = vpop.f32.mrf.mxu0  ;;  %v3160_v47 = vpop.eup %3159  ;;  %3169 = vrcp.f32 %v4122_v52  ;;  %vm1277_vm7 = vcmp.eq.f32.partialorder %v1276_v10, 8.507059e+37 }
 0x161   : > { %v819_v63 = vadd.f32 %v3315_v11, %v818_v56  ;;  %v907_v24 = vpop.f32.mrf.mxu1  ;;  %1945 = vrot.lane.b32.xlu0 %v3160_v47, %s3324_s19  ;;  %1925 = vrot.lane.b32.xlu2 %v3158_v26, %s3324_s19  ;;  %v4134_v62 = vpop.eup %3161  ;;  %v1264_v56 = vor.u32 1.1754944e-38, %v1263_v39  ;;  %3171 = vpow2.f32 %v2937_v53  ;;  %v1278_v53 = vand.u32 2147483648, %v4010_v20 }
 0x162   : > { %2055 = vrot.lane.b32.xlu1 %v1985_v14, %s3324_s19  ;;  %v3164_v21 = vpop.eup %3163  ;;  %v1898_v37 = vpop.permute.xlu0 %1897  ;;  %v1298_v28 = vmul.f32 %v4134_v62, %v4083_v61  ;;  %v1275_v20 = vsel %vm4180_vm5, %v4068_v34, %v1271_v4  ;;  %vm1303_vm11 = vweird.f32 %v4134_v62 }
 0x163   : > { %v908_v11 = vadd.f32 %v907_v24, %v819_v63  ;;  %v4148_v26 = vpop.eup %3165  ;;  %v4155_v24 = vsel %vm1262_vm1, %v1264_v56, %v1260_v54  ;;  %v4157_v48 = vadd.f32 1.0, %v3164_v21  ;;  %v1291_v56 = vand.u32 2147483647, %v4045_v7  ;;  %v1902_v58 = vpop.permute.xlu2 %1901  ;;  %vm4232_vm13 = vmor %vm1302_vm10, %vm1303_vm11 }
 0x164   : > { %v1986_v27 = vmul.f32 %v1898_v37, %v4155_v24  ;;  %v1328_v8 = vmul.f32 %v4148_v26, %v4094_v59  ;;  %v1299_v37 = vsub.f32 1.0, %v1298_v28  ;;  %v1279_v28 = vor.u32 1.1754944e-38, %v1278_v53 }
 0x165   : > { %v4150_v47 = vadd.f32 %v996_v1, %v908_v11  ;;  %v3168_v14 = vpop.eup %3167  ;;  %v1285_v1 = vmul.f32 %v4100_v12, %v1284_v2  ;;  %v2938_v11 = vmul.f32 -1.442695, %v3825_v36  ;;  %vm1292_vm9 = vcmp.eq.f32.partialorder %v1291_v56, 8.507059e+37 }
 0x166   : > { %v4169_v31 = vpop.eup %3169  ;;  %v1329_v54 = vsub.f32 1.0, %v1328_v8  ;;  %v1300_v34 = vmul.f32 %v4134_v62, %v1299_v37  ;;  %v4202_v8 = vsel %vm1277_vm7, %v1279_v28, %v1275_v20  ;;  %v1308_v56 = vand.u32 2147483648, %v4083_v61 }
 0x167   : > { %v999_v63 = vpop.f32.mrf.mxu2  ;;  %3173 = vtanh.f32 %v4150_v47  ;;  %v3172_v36 = vpop.eup %3171  ;;  %v1286_v21 = vadd.f32 %v4100_v12, %v1285_v1  ;;  %vm1333_vm12 = vweird.f32 %v4148_v26  ;;  %vm1318_vm1 = vweird.f32 %v4169_v31 }
 0x168   : > { %v4164_v39 = vadd.f32 %v999_v63, %v3741_v51  ;;  %3175 = vrcp.f32 %v4157_v48  ;;  %v1293_v63 = vand.u32 2147483648, %v4045_v7  ;;  %v1330_v37 = vmul.f32 %v4148_v26, %v1329_v54  ;;  %vm4247_vm15 = vmor %vm1332_vm14, %vm1333_vm12 }
 0x169   : > { %1927 = vrot.lane.b32.xlu0 %v3168_v14, %s3324_s19  ;;  %2057 = vrot.lane.b32.xlu2 %v1986_v27, %s3324_s19  ;;  %v1900_v14 = vpop.permute.xlu1 %1899  ;;  %v1313_v27 = vmul.f32 %v4169_v31, %v4122_v52  ;;  %v1290_v7 = vsel %vm4198_vm8, %v4100_v12, %v1286_v21  ;;  %v1301_v28 = vadd.f32 %v4134_v62, %v1300_v34  ;;  %v1338_v21 = vand.u32 2147483648, %v4094_v59  ;;  %vm1319_vm4 = vmor %vm1317_vm3, %vm1318_vm1 }
 0x16a   : > { %3177 = vtanh.f32 %v4164_v39  ;;  %v1987_v10 = vmul.f32 %v1900_v14, %v4202_v8  ;;  %v1306_v54 = vand.u32 2147483647, %v4083_v61  ;;  %v1331_v14 = vadd.f32 %v4148_v26, %v1330_v37 }
 0x16b   : > { %3179 = vpow2.f32 %v2938_v11  ;;  %v4207_v11 = vadd.f32 1.0, %v3172_v36  ;;  %v1314_v20 = vsub.f32 1.0, %v1313_v27  ;;  %v2951_v36 = vmul.f32 -1.442695, %v3939_v30 }
 0x16c   : > { %v1336_v61 = vand.u32 2147483647, %v4094_v59  ;;  %v1309_v37 = vor.u32 1.1754944e-38, %v1308_v56  ;;  %vm1307_vm0 = vcmp.eq.f32.partialorder %v1306_v54, 8.507059e+37  ;;  %v2940_v59 = vmul.f32 -1.442695, %v3883_v17 }
 0x16d   : > { %v3174_v2 = vpop.eup %3173  ;;  %v2942_v56 = vmul.f32 -1.442695, %v3953_v13  ;;  %v1321_v54 = vand.u32 2147483647, %v4122_v52  ;;  %vm1377_vm7 = vweird.f32 %v4157_v48  ;;  %vm1347_vm11 = vweird.f32 %v4207_v11 }
 0x16e   : > { %1929 = vrot.lane.b32.xlu1 %v3174_v2, %s3324_s19  ;;  %v4214_v51 = vpop.eup %3175  ;;  %v1294_v2 = vor.u32 1.1754944e-38, %v1293_v63  ;;  %vm1337_vm2 = vcmp.eq.f32.partialorder %v1336_v61, 8.507059e+37 }
 0x16f   : > { %v1001_v1 = vpop.f32.mrf.mxu2  ;;  %v1373_v34 = vmul.f32 %v4214_v51, %v4157_v48  ;;  %vm1322_vm5 = vcmp.eq.f32.partialorder %v1321_v54, 8.507059e+37  ;;  %vm1378_vm6 = vweird.f32 %v4214_v51 }
 0x170   : > { %v4205_v53 = vadd.f32 %v1001_v1, %v3756_v6  ;;  %v3178_v6 = vpop.eup %3177  ;;  %v4222_v12 = vsel %vm1292_vm9, %v1294_v2, %v1290_v7  ;;  %v1315_v1 = vmul.f32 %v4169_v31, %v1314_v20  ;;  %v1335_v2 = vsel %vm4247_vm15, %v4148_v26, %v1331_v14  ;;  %vm1379_vm8 = vmor %vm1377_vm7, %vm1378_vm6 }
 0x171   : > { %2059 = vrot.lane.b32.xlu0 %v1987_v10, %s3324_s19  ;;  %1931 = vrot.lane.b32.xlu2 %v3178_v6, %s3324_s19  ;;  %v3180_v63 = vpop.eup %3179  ;;  %v1988_v30 = vmul.f32 %v1902_v58, %v4222_v12  ;;  %v1305_v58 = vsel %vm4232_vm13, %v4134_v62, %v1301_v28  ;;  %v1339_v20 = vor.u32 1.1754944e-38, %v1338_v21  ;;  %v1908_v6 = vpop.permute.xlu2 %1907  ;;  %v1323_v21 = vand.u32 2147483648, %v4122_v52 }
 0x172   : > { %3181 = vtanh.f32 %v4205_v53  ;;  %v4245_v7 = vadd.f32 1.0, %v3180_v63  ;;  %v4256_v62 = vsel %vm1307_vm0, %v1309_v37, %v1305_v58  ;;  %v1316_v28 = vadd.f32 %v4169_v31, %v1315_v1 }
 0x173   : > { %3183 = vrcp.f32 %v4207_v11  ;;  %v1374_v63 = vsub.f32 1.0, %v1373_v34  ;;  %v4266_v17 = vsel %vm1337_vm2, %v1339_v20, %v1335_v2  ;;  %v1324_v52 = vor.u32 1.1754944e-38, %v1323_v21 }
 0x174   : > { %3185 = vpow2.f32 %v2951_v36  ;;  %v1991_v27 = vmul.f32 %v1908_v6, %v4266_v17  ;;  %v1320_v13 = vsel %vm1319_vm4, %v4169_v31, %v1316_v28  ;;  %v2950_v58 = vmul.f32 -1.442695, %v3903_v25 }
 0x175   : > { %3187 = vrcp.f32 %v4245_v7  ;;  %v1375_v1 = vmul.f32 %v4214_v51, %v1374_v63  ;;  %v1381_v25 = vand.u32 2147483647, %v4157_v48  ;;  %vm1362_vm15 = vweird.f32 %v4245_v7 }
 0x176   : > { %2061 = vrot.lane.b32.xlu1 %v1988_v30, %s3324_s19  ;;  %3189 = vpow2.f32 %v2940_v59  ;;  %v1383_v59 = vand.u32 2147483648, %v4157_v48 }
 0x177   : > { %3191 = vpow2.f32 %v2942_v56  ;;  %v1376_v2 = vadd.f32 %v4214_v51, %v1375_v1  ;;  %vm1382_vm9 = vcmp.eq.f32.partialorder %v1381_v25, 8.507059e+37  ;;  %v1820_v25 = vmul.f32 %v3685_v45, %v3909_v33 }
 0x178   : > { %v3182_v4 = vpop.eup %3181  ;;  %v1904_v36 = vpop.permute.xlu0 %1903  ;;  %v1384_v21 = vor.u32 1.1754944e-38, %v1383_v59  ;;  %v2954_v59 = vmul.f32 -1.442695, %v4040_v57  ;;  %v2952_v45 = vmul.f32 -1.442695, %v3964_v42 }
 0x179   : > { %v4259_v30 = vpop.eup %3183  ;;  %1933 = vrot.lane.b32.xlu0 %v3182_v4, %s3324_s19  ;;  %v1989_v26 = vmul.f32 %v1904_v36, %v4256_v62  ;;  %v4282_v4 = vsel %vm1322_vm5, %v1324_v52, %v1320_v13  ;;  %v1380_v63 = vsel %vm1379_vm8, %v4214_v51, %v1376_v2  ;;  %v2941_v52 = vmul.f32 -1.442695, %v3925_v9 }
 0x17a   : > { %v3186_v14 = vpop.eup %3185  ;;  %v1343_v34 = vmul.f32 %v4259_v30, %v4207_v11  ;;  %vm1348_vm10 = vweird.f32 %v4259_v30 }
 0x17b   : > { %2063 = vrot.lane.b32.xlu2 %v1989_v26, %s3324_s19  ;;  %v4279_v61 = vadd.f32 1.0, %v3186_v14  ;;  %v4284_v37 = vpop.eup %3187  ;;  %v4302_v14 = vsel %vm1382_vm9, %v1384_v21, %v1380_v63  ;;  %vm1349_vm12 = vmor %vm1347_vm11, %vm1348_vm10 }
 0x17c   : > { %v1344_v20 = vsub.f32 1.0, %v1343_v34  ;;  %v3190_v6 = vpop.eup %3189  ;;  %v1358_v28 = vmul.f32 %v4284_v37, %v4245_v7  ;;  %vm1363_vm14 = vweird.f32 %v4284_v37 }
 0x17d   : > { %3193 = vrcp.f32 %v4279_v61  ;;  %v3192_v36 = vpop.eup %3191  ;;  %v4298_v26 = vadd.f32 1.0, %v3190_v6  ;;  %vm1364_vm0 = vmor %vm1362_vm15, %vm1363_vm14  ;;  %vm1557_vm3 = vweird.f32 %v4279_v61 }
 0x17e   : > { %2067 = vrot.lane.b32.xlu1 %v1991_v27, %s3324_s19  ;;  %3195 = vpow2.f32 %v2950_v58  ;;  %v1345_v56 = vmul.f32 %v4259_v30, %v1344_v20  ;;  %v4300_v54 = vadd.f32 1.0, %v3192_v36  ;;  %v1359_v48 = vsub.f32 1.0, %v1358_v28 }
 0x17f   : > { %3197 = vrcp.f32 %v4298_v26  ;;  %v1353_v58 = vand.u32 2147483648, %v4207_v11  ;;  %vm1392_vm6 = vweird.f32 %v4298_v26 }
 0x180   : > { %v1906_v10 = vpop.permute.xlu1 %1905  ;;  %v1346_v34 = vadd.f32 %v4259_v30, %v1345_v56  ;;  %3199 = vrcp.f32 %v4300_v54  ;;  %vm1422_vm9 = vweird.f32 %v4300_v54 }
 0x181   : > { %v1990_v31 = vmul.f32 %v1906_v10, %v4282_v4  ;;  %v1351_v10 = vand.u32 2147483647, %v4207_v11  ;;  %3201 = vpow2.f32 %v2941_v52  ;;  %v1354_v6 = vor.u32 1.1754944e-38, %v1353_v58 }
 0x182   : > { %v1350_v9 = vsel %vm1349_vm12, %v4259_v30, %v1346_v34  ;;  %v1368_v11 = vand.u32 2147483648, %v4245_v7 }
 0x183   : > { %2065 = vrot.lane.b32.xlu0 %v1990_v31, %s3324_s19  ;;  %v4304_v13 = vpop.eup %3193  ;;  %v1360_v31 = vmul.f32 %v4284_v37, %v1359_v48  ;;  %vm1352_vm13 = vcmp.eq.f32.partialorder %v1351_v10, 8.507059e+37 }
 0x184   : > { %v3196_v51 = vpop.eup %3195  ;;  %v1553_v2 = vmul.f32 %v4304_v13, %v4279_v61  ;;  %v4328_v28 = vsel %vm1352_vm13, %v1354_v6, %v1350_v9  ;;  %v1369_v10 = vor.u32 1.1754944e-38, %v1368_v11  ;;  %vm1558_vm2 = vweird.f32 %v4304_v13 }
 0x185   : > { %v4319_v20 = vadd.f32 1.0, %v3196_v51  ;;  %v4326_v36 = vpop.eup %3197  ;;  %v1361_v21 = vadd.f32 %v4284_v37, %v1360_v31  ;;  %vm4367_vm4 = vmor %vm1557_vm3, %vm1558_vm2 }
 0x186   : > { %v1554_v30 = vsub.f32 1.0, %v1553_v2  ;;  %v1388_v34 = vmul.f32 %v4326_v36, %v4298_v26  ;;  %vm1393_vm7 = vweird.f32 %v4326_v36 }
 0x187   : > { %3203 = vrcp.f32 %v4319_v20  ;;  %v1365_v42 = vsel %vm1364_vm0, %v4284_v37, %v1361_v21  ;;  %v2943_v37 = vmul.f32 -1.442695, %v3991_v50  ;;  %v1563_v21 = vand.u32 2147483648, %v4279_v61  ;;  %vm4407_vm10 = vmor %vm1392_vm6, %vm1393_vm7 }
 0x188   : > { %v1914_v27 = vpop.permute.xlu2 %1913  ;;  %3205 = vpow2.f32 %v2954_v59  ;;  %v1555_v52 = vmul.f32 %v4304_v13, %v1554_v30  ;;  %v1389_v59 = vsub.f32 1.0, %v1388_v34  ;;  %v1561_v30 = vand.u32 2147483647, %v4279_v61 }
 0x189   : > { %v1994_v1 = vmul.f32 %v1914_v27, %v4302_v14  ;;  %v4332_v27 = vpop.eup %3199  ;;  %vm1542_vm15 = vweird.f32 %v4319_v20 }
 0x18a   : > { %v3202_v51 = vpop.eup %3201  ;;  %v1418_v58 = vmul.f32 %v4332_v27, %v4300_v54  ;;  %vm1562_vm5 = vcmp.eq.f32.partialorder %v1561_v30, 8.507059e+37  ;;  %vm1423_vm8 = vweird.f32 %v4332_v27  ;;  %v1426_v30 = vand.u32 2147483647, %v4300_v54 }
 0x18b   : > { %2073 = vrot.lane.b32.xlu1 %v1994_v1, %s3324_s19  ;;  %v1366_v1 = vand.u32 2147483647, %v4245_v7  ;;  %v2945_v7 = vmul.f32 -1.442695, %v4073_v43  ;;  %v4352_v2 = vadd.f32 1.0, %v3202_v51  ;;  %vm4417_vm11 = vmor %vm1422_vm9, %vm1423_vm8 }
 0x18c   : > { %vm1427_vm12 = vcmp.eq.f32.partialorder %v1426_v30, 8.507059e+37 }
 0x18d   : > { %vm1367_vm1 = vcmp.eq.f32.partialorder %v1366_v1, 8.507059e+37  ;;  %v4350_v31 = vpop.eup %3203  ;;  %vm1407_vm3 = vweird.f32 %v4352_v2 }
 0x18e   : > { %v4354_v9 = vsel %vm1367_vm1, %v1369_v10, %v1365_v42  ;;  %v3206_v6 = vpop.eup %3205  ;;  %v1538_v1 = vmul.f32 %v4350_v31, %v4319_v20  ;;  %v1390_v42 = vmul.f32 %v4326_v36, %v1389_v59  ;;  %v1819_v10 = vmul.f32 %v3662_v22, %v3873_v55 }
 0x18f   : > { %v4365_v50 = vadd.f32 1.0, %v3206_v6  ;;  %vm1543_vm14 = vweird.f32 %v4350_v31 }
 0x190   : > { %v1910_v63 = vpop.permute.xlu0 %1909  ;;  %v2046_v56 = vpop.permute.xlu2 %2045  ;;  %v1391_v22 = vadd.f32 %v4326_v36, %v1390_v42  ;;  %vm4461_vm0 = vmor %vm1542_vm15, %vm1543_vm14 }
 0x191   : > { %v1992_v57 = vmul.f32 %v1910_v63, %v4328_v28  ;;  %v4337_v48 = vadd.f32 %v2046_v56, %v1820_v25  ;;  %v1556_v63 = vadd.f32 %v4304_v13, %v1555_v52  ;;  %v1419_v56 = vsub.f32 1.0, %v1418_v58 }
 0x192   : > { %v2953_v52 = vmul.f32 -1.442695, %v3997_v5  ;;  %v1564_v58 = vor.u32 1.1754944e-38, %v1563_v21  ;;  %vm1602_vm8 = vweird.f32 %v4365_v50 }
 0x193   : > { %3207 = vtanh.f32 %v4337_v48  ;;  %2069 = vrot.lane.b32.xlu2 %v1992_v57, %s3324_s19  ;;  %v1560_v61 = vsel %vm4367_vm4, %v4304_v13, %v1556_v63  ;;  %v1420_v51 = vmul.f32 %v4332_v27, %v1419_v56  ;;  %v1539_v13 = vsub.f32 1.0, %v1538_v1 }
 0x194   : > { %3209 = vpow2.f32 %v2952_v45  ;;  %v4386_v6 = vsel %vm1562_vm5, %v1564_v58, %v1560_v61  ;;  %v1396_v57 = vand.u32 2147483647, %v4298_v26 }
 0x195   : > { %3211 = vpow2.f32 %v2945_v7  ;;  %v1540_v61 = vmul.f32 %v4350_v31, %v1539_v13 }
 0x196   : > { %3213 = vrcp.f32 %v4352_v2  ;;  %vm1397_vm13 = vcmp.eq.f32.partialorder %v1396_v57, 8.507059e+37 }
 0x197   : > { %3215 = vpow2.f32 %v2943_v37 }
 0x198   : > { %v1912_v25 = vpop.permute.xlu1 %1911  ;;  %3217 = vrcp.f32 %v4365_v50 }
 0x199   : > { %v3208_v11 = vpop.eup %3207  ;;  %v1993_v43 = vmul.f32 %v1912_v25, %v4354_v9  ;;  %v1421_v25 = vadd.f32 %v4332_v27, %v1420_v51  ;;  %3219 = vpow2.f32 %v2953_v52 }
 0x19a   : > { %2237 = vrot.lane.b32.xlu1 %v3208_v11, %s3324_s19  ;;  %v3210_v45 = vpop.eup %3209  ;;  %v1428_v11 = vand.u32 2147483648, %v4300_v54  ;;  %v1546_v54 = vand.u32 2147483647, %v4319_v20 }
 0x19b   : > { %2071 = vrot.lane.b32.xlu0 %v1993_v43, %s3324_s19  ;;  %v1938_v34 = vpop.permute.xlu2 %1937  ;;  %v4382_v7 = vadd.f32 1.0, %v3210_v45  ;;  %v3212_v37 = vpop.eup %3211  ;;  %v1398_v43 = vand.u32 2147483648, %v4298_v26  ;;  %v1425_v51 = vsel %vm4417_vm11, %v4332_v27, %v1421_v25  ;;  %v1395_v26 = vsel %vm4407_vm10, %v4326_v36, %v1391_v22 }
 0x19c   : > { %v2006_v59 = vmul.f32 %v1938_v34, %v4386_v6  ;;  %v4393_v63 = vpop.eup %3213  ;;  %v4412_v1 = vadd.f32 1.0, %v3212_v37  ;;  %v2944_v34 = vmul.f32 -1.442695, %v4033_v15  ;;  %v1429_v37 = vor.u32 1.1754944e-38, %v1428_v11 }
 0x19d   : > { %v3216_v21 = vpop.eup %3215  ;;  %3221 = vrcp.f32 %v4382_v7  ;;  %v1403_v52 = vmul.f32 %v4393_v63, %v4352_v2  ;;  %v1399_v13 = vor.u32 1.1754944e-38, %v1398_v43  ;;  %v2948_v15 = vmul.f32 -1.442695, %v4164_v39 }
 0x19e   : > { %v4431_v58 = vpop.eup %3217  ;;  %v1548_v45 = vand.u32 2147483648, %v4319_v20  ;;  %vm1547_vm1 = vcmp.eq.f32.partialorder %v1546_v54, 8.507059e+37  ;;  %vm1408_vm2 = vweird.f32 %v4393_v63  ;;  %vm1572_vm5 = vweird.f32 %v4382_v7 }
 0x19f   : > { %v3220_v27 = vpop.eup %3219  ;;  %v4440_v36 = vsel %vm1397_vm13, %v1399_v13, %v1395_v26  ;;  %v1598_v39 = vmul.f32 %v4431_v58, %v4365_v50  ;;  %v1404_v43 = vsub.f32 1.0, %v1403_v52  ;;  %v2955_v13 = vmul.f32 -1.442695, %v4079_v19  ;;  %vm4510_vm6 = vmor %vm1407_vm3, %vm1408_vm2 }
 0x1a0   : > { %v2044_v5 = vpop.permute.xlu1 %2043  ;;  %v4451_v57 = vadd.f32 1.0, %v3220_v27  ;;  %v1549_v27 = vor.u32 1.1754944e-38, %v1548_v45  ;;  %vm1603_vm7 = vweird.f32 %v4431_v58  ;;  %vm1467_vm15 = vweird.f32 %v4412_v1 }
 0x1a1   : > { %v4395_v56 = vadd.f32 %v2044_v5, %v1819_v10  ;;  %v4433_v10 = vadd.f32 1.0, %v3216_v21  ;;  %v1541_v5 = vadd.f32 %v4350_v31, %v1540_v61  ;;  %v1823_v61 = vmul.f32 %v3655_v16, %v4036_v46  ;;  %vm4534_vm10 = vmor %vm1602_vm8, %vm1603_vm7 }
 0x1a2   : > { %2097 = vrot.lane.b32.xlu1 %v2006_v59, %s3324_s19  ;;  %v4438_v59 = vsel %vm1427_vm12, %v1429_v37, %v1425_v51  ;;  %v1599_v52 = vsub.f32 1.0, %v1598_v39  ;;  %v1405_v16 = vmul.f32 %v4393_v63, %v1404_v43  ;;  %vm1587_vm7 = vweird.f32 %v4451_v57 }
 0x1a3   : > { %3223 = vtanh.f32 %v4395_v56  ;;  %v1920_v42 = vpop.permute.xlu2 %1919  ;;  %v4443_v25 = vpop.eup %3221  ;;  %v1545_v20 = vsel %vm4461_vm0, %v4350_v31, %v1541_v5  ;;  %v1411_v31 = vand.u32 2147483647, %v4352_v2  ;;  %vm1437_vm2 = vweird.f32 %v4433_v10 }
 0x1a4   : > { %3225 = vrcp.f32 %v4412_v1  ;;  %v1997_v22 = vmul.f32 %v1920_v42, %v4438_v59  ;;  %v1568_v51 = vmul.f32 %v4443_v25, %v4382_v7  ;;  %v4484_v39 = vsel %vm1547_vm1, %v1549_v27, %v1545_v20 }
 0x1a5   : > { %3227 = vpow2.f32 %v2944_v34  ;;  %v1406_v45 = vadd.f32 %v4393_v63, %v1405_v16  ;;  %vm4499_vm4 = vcmp.eq.f32.partialorder %v1411_v31, 8.507059e+37  ;;  %vm1573_vm9 = vweird.f32 %v4443_v25 }
 0x1a6   : > { %3229 = vrcp.f32 %v4433_v10  ;;  %v1569_v19 = vsub.f32 1.0, %v1568_v51  ;;  %v2946_v51 = vmul.f32 -1.442695, %v4115_v29  ;;  %v1576_v20 = vand.u32 2147483647, %v4382_v7  ;;  %vm4558_vm12 = vmor %vm1572_vm5, %vm1573_vm9 }
 0x1a7   : > { %3231 = vpow2.f32 %v2948_v15 }
 0x1a8   : > { %v1916_v11 = vpop.permute.xlu0 %1915  ;;  %3233 = vrcp.f32 %v4451_v57  ;;  %v1570_v29 = vmul.f32 %v4443_v25, %v1569_v19  ;;  %v2947_v19 = vmul.f32 -1.442695, %v4150_v47  ;;  %vm1577_vm14 = vcmp.eq.f32.partialorder %v1576_v20, 8.507059e+37 }
 0x1a9   : > { %v3224_v21 = vpop.eup %3223  ;;  %v1995_v30 = vmul.f32 %v1916_v11, %v4440_v36  ;;  %v1821_v11 = vmul.f32 %v3675_v38, %v3944_v44  ;;  %v1600_v38 = vmul.f32 %v4431_v58, %v1599_v52  ;;  %v1578_v52 = vand.u32 2147483648, %v4382_v7 }
 0x1aa   : > { %2079 = vrot.lane.b32.xlu1 %v1997_v22, %s3324_s19  ;;  %2235 = vrot.lane.b32.xlu0 %v3224_v21, %s3324_s19  ;;  %v4472_v37 = vpop.eup %3225  ;;  %v1443_v20 = vand.u32 2147483648, %v4433_v10 }
 0x1ab   : > { %2075 = vrot.lane.b32.xlu2 %v1995_v30, %s3324_s19  ;;  %v2052_v42 = vpop.permute.xlu2 %2051  ;;  %v1936_v26 = vpop.permute.xlu1 %1935  ;;  %v1463_v54 = vmul.f32 %v4472_v37, %v4412_v1  ;;  %vm1468_vm13 = vweird.f32 %v4472_v37 }
 0x1ac   : > { %v4475_v15 = vadd.f32 %v2052_v42, %v1823_v61  ;;  %v3228_v22 = vpop.eup %3227  ;;  %v2005_v21 = vmul.f32 %v1936_v26, %v4484_v39  ;;  %v1413_v42 = vand.u32 2147483648, %v4352_v2  ;;  %vm4592_vm0 = vmor %vm1467_vm15, %vm1468_vm13 }
 0x1ad   : > { %v4481_v5 = vpop.eup %3229  ;;  %v4492_v61 = vadd.f32 1.0, %v3228_v22  ;;  %v1410_v22 = vsel %vm4510_vm6, %v4393_v63, %v1406_v45  ;;  %v1464_v31 = vsub.f32 1.0, %v1463_v54  ;;  %v1571_v54 = vadd.f32 %v4443_v25, %v1570_v29 }
 0x1ae   : > { %5193 = vst [vmem:[#allocation23_spill] sm:$0xff] %v4475_v15  ;;  %3235 = vtanh.f32 %v4475_v15  ;;  %v3232_v43 = vpop.eup %3231  ;;  %v1433_v2 = vmul.f32 %v4481_v5, %v4433_v10  ;;  %vm1438_vm1 = vweird.f32 %v4481_v5 }
 0x1af   : > { %3237 = vpow2.f32 %v2955_v13  ;;  %v4505_v26 = vadd.f32 1.0, %v3232_v43  ;;  %v4517_v16 = vpop.eup %3233  ;;  %v1601_v13 = vadd.f32 %v4431_v58, %v1600_v38  ;;  %v1606_v38 = vand.u32 2147483647, %v4365_v50 }
 0x1b0   : > { %v2048_v30 = vpop.permute.xlu0 %2047  ;;  %vm1588_vm5 = vweird.f32 %v4517_v16 }
 0x1b1   : > { %v4494_v34 = vadd.f32 %v2048_v30, %v1821_v11  ;;  %v1414_v30 = vor.u32 1.1754944e-38, %v1413_v42  ;;  %v1605_v42 = vsel %vm4534_vm10, %v4431_v58, %v1601_v13  ;;  %vm1607_vm11 = vcmp.eq.f32.partialorder %v1606_v38, 8.507059e+37  ;;  %vm1589_vm8 = vmor %vm1587_vm7, %vm1588_vm5 }
 0x1b2   : > { %2095 = vrot.lane.b32.xlu0 %v2005_v21, %s3324_s19  ;;  %v1608_v21 = vand.u32 2147483648, %v4365_v50  ;;  %v1434_v50 = vsub.f32 1.0, %v1433_v2  ;;  %v1822_v13 = vmul.f32 %v3696_v60, %v3993_v32  ;;  %v1473_v60 = vand.u32 2147483648, %v4412_v1 }
 0x1b3   : > { %5194 = vst [vmem:[#allocation24_spill] sm:$0xff] %v4494_v34  ;;  %3239 = vtanh.f32 %v4494_v34  ;;  %v1944_v27 = vpop.permute.xlu2 %1943  ;;  %v1918_v11 = vpop.permute.xlu1 %1917  ;;  %v4540_v47 = vsel %vm4499_vm4, %v1414_v30, %v1410_v22  ;;  %v1583_v22 = vmul.f32 %v4517_v16, %v4451_v57  ;;  %v1579_v30 = vor.u32 1.1754944e-38, %v1578_v52  ;;  %vm4612_vm4 = vmor %vm1437_vm2, %vm1438_vm1 }
 0x1b4   : > { %v3236_v43 = vpop.eup %3235  ;;  %3241 = vrcp.f32 %v4492_v61  ;;  %v1609_v34 = vor.u32 1.1754944e-38, %v1608_v21  ;;  %v1435_v7 = vmul.f32 %v4481_v5, %v1434_v50 }
 0x1b5   : > { %3243 = vpow2.f32 %v2946_v51  ;;  %2243 = vrot.lane.b32.xlu1 %v3236_v43, %s3324_s19  ;;  %v3238_v63 = vpop.eup %3237  ;;  %v1996_v51 = vmul.f32 %v1918_v11, %v4540_v47  ;;  %v1465_v43 = vmul.f32 %v4472_v37, %v1464_v31  ;;  %v1575_v31 = vsel %vm4558_vm12, %v4443_v25, %v1571_v54 }
 0x1b6   : > { %3245 = vrcp.f32 %v4505_v26  ;;  %v4552_v29 = vadd.f32 1.0, %v3238_v63  ;;  %v4568_v11 = vsel %vm1607_vm11, %v1609_v34, %v1605_v42  ;;  %v1584_v34 = vsub.f32 1.0, %v1583_v22 }
 0x1b7   : > { %3247 = vpow2.f32 %v2947_v19  ;;  %v2009_v21 = vmul.f32 %v1944_v27, %v4568_v11  ;;  %v1466_v38 = vadd.f32 %v4472_v37, %v1465_v43  ;;  %v4582_v54 = vsel %vm1577_vm14, %v1579_v30, %v1575_v31 }
 0x1b8   : > { %3249 = vrcp.f32 %v4552_v29  ;;  %v1471_v27 = vand.u32 2147483647, %v4412_v1  ;;  %v1436_v43 = vadd.f32 %v4481_v5, %v1435_v7  ;;  %v1585_v31 = vmul.f32 %v4517_v16, %v1584_v34 }
 0x1b9   : > { %v3240_v15 = vpop.eup %3239  ;;  %v1470_v22 = vsel %vm4592_vm0, %v4472_v37, %v1466_v38  ;;  %v1441_v37 = vand.u32 2147483647, %v4433_v10  ;;  %v1826_v30 = vmul.f32 %v3714_v18, %v4155_v24  ;;  %v1444_v34 = vor.u32 1.1754944e-38, %v1443_v20 }
 0x1ba   : > { %2239 = vrot.lane.b32.xlu2 %v3240_v15, %s3324_s19  ;;  %2077 = vrot.lane.b32.xlu0 %v1996_v51, %s3324_s19  ;;  %v4564_v2 = vpop.eup %3241  ;;  %vm1472_vm3 = vcmp.eq.f32.partialorder %v1471_v27, 8.507059e+37  ;;  %v1440_v38 = vsel %vm4612_vm4, %v4481_v5, %v1436_v43  ;;  %v1586_v18 = vadd.f32 %v4517_v16, %v1585_v31  ;;  %v2949_v5 = vmul.f32 -1.442695, %v4205_v53 }
 0x1bb   : > { %v3244_v19 = vpop.eup %3243  ;;  %v1940_v15 = vpop.permute.xlu0 %1939  ;;  %v1448_v7 = vmul.f32 %v4564_v2, %v4492_v61  ;;  %vm1442_vm6 = vcmp.eq.f32.partialorder %v1441_v37, 8.507059e+37  ;;  %v1591_v20 = vand.u32 2147483647, %v4451_v57  ;;  %vm1453_vm10 = vweird.f32 %v4564_v2 }
 0x1bc   : > { %v1926_v63 = vpop.permute.xlu2 %1925  ;;  %v4577_v45 = vpop.eup %3245  ;;  %v4588_v51 = vadd.f32 1.0, %v3244_v19  ;;  %v2007_v1 = vmul.f32 %v1940_v15, %v4582_v54  ;;  %v4637_v43 = vsel %vm1442_vm6, %v1444_v34, %v1440_v38  ;;  %vm1512_vm12 = vweird.f32 %v4505_v26 }
 0x1bd   : > { %v2050_v25 = vpop.permute.xlu1 %2049  ;;  %2103 = vrot.lane.b32.xlu1 %v2009_v21, %s3324_s19  ;;  %v3248_v42 = vpop.eup %3247  ;;  %v1508_v58 = vmul.f32 %v4577_v45, %v4505_v26  ;;  %vm1592_vm9 = vcmp.eq.f32.partialorder %v1591_v20, 8.507059e+37  ;;  %vm1513_vm11 = vweird.f32 %v4577_v45  ;;  %v1456_v20 = vand.u32 2147483647, %v4492_v61 }
 0x1be   : > { %v4585_v50 = vadd.f32 %v2050_v25, %v1822_v13  ;;  %v1474_v13 = vor.u32 1.1754944e-38, %v1473_v60  ;;  %v4610_v19 = vadd.f32 1.0, %v3248_v42  ;;  %v4625_v60 = vpop.eup %3249  ;;  %vm4676_vm13 = vmor %vm1512_vm12, %vm1513_vm11  ;;  %vm1452_vm14 = vweird.f32 %v4492_v61 }
 0x1bf   : > { %v1509_v42 = vsub.f32 1.0, %v1508_v58  ;;  %v1613_v31 = vmul.f32 %v4625_v60, %v4552_v29  ;;  %vm1454_vm15 = vmor %vm1452_vm14, %vm1453_vm10  ;;  %vm1457_vm1 = vcmp.eq.f32.partialorder %v1456_v20, 8.507059e+37  ;;  %vm1618_vm2 = vweird.f32 %v4625_v60 }
 0x1c0   : > { %3251 = vtanh.f32 %v4585_v50  ;;  %v4620_v15 = vsel %vm1472_vm3, %v1474_v13, %v1470_v22  ;;  %v1449_v22 = vsub.f32 1.0, %v1448_v7  ;;  %v1590_v7 = vsel %vm1589_vm8, %v4517_v16, %v1586_v18 }
 0x1c1   : > { %3253 = vrcp.f32 %v4588_v51  ;;  %v2000_v25 = vmul.f32 %v1926_v63, %v4620_v15  ;;  %v1593_v63 = vand.u32 2147483648, %v4451_v57  ;;  %v1510_v53 = vmul.f32 %v4577_v45, %v1509_v42 }
 0x1c2   : > { %2099 = vrot.lane.b32.xlu2 %v2007_v1, %s3324_s19  ;;  %3255 = vrcp.f32 %v4610_v19  ;;  %v1450_v21 = vmul.f32 %v4564_v2, %v1449_v22  ;;  %v1518_v22 = vand.u32 2147483648, %v4505_v26  ;;  %vm1617_vm3 = vweird.f32 %v4552_v29 }
 0x1c3   : > { %v1922_v27 = vpop.permute.xlu0 %1921  ;;  %v1594_v57 = vor.u32 1.1754944e-38, %v1593_v63  ;;  %v1511_v16 = vadd.f32 %v4577_v45, %v1510_v53  ;;  %vm1619_vm4 = vmor %vm1617_vm3, %vm1618_vm2  ;;  %vm1497_vm8 = vweird.f32 %v4610_v19  ;;  %vm2491_vm2 = vcmask 261120  }
 0x1c4   : > { %v2058_v10 = vpop.permute.xlu2 %2057  ;;  %v1998_v58 = vmul.f32 %v1922_v27, %v4637_v43  ;;  %v1614_v27 = vsub.f32 1.0, %v1613_v31  ;;  %vm2524_vm3 = vcmask 523520  }
 0x1c5   : > { %v4629_v52 = vadd.f32 %v2058_v10, %v1826_v30  ;;  %v1942_v1 = vpop.permute.xlu1 %1941  ;;  %2085 = vrot.lane.b32.xlu1 %v2000_v25, %s3324_s19  ;;  %v1824_v30 = vmul.f32 %v3679_v41, %v4075_v40  ;;  %v4659_v25 = vsel %vm1592_vm9, %v1594_v57, %v1590_v7  ;;  %v1451_v41 = vadd.f32 %v4564_v2, %v1450_v21 }
 0x1c6   : > { %v3252_v13 = vpop.eup %3251  ;;  %v2008_v42 = vmul.f32 %v1942_v1, %v4659_v25  ;;  %v1515_v31 = vsel %vm4676_vm13, %v4577_v45, %v1511_v16  ;;  %v1615_v7 = vmul.f32 %v4625_v60, %v1614_v27  ;;  %v1519_v57 = vor.u32 1.1754944e-38, %v1518_v22 }
 0x1c7   : > { %3257 = vtanh.f32 %v4629_v52  ;;  %2241 = vrot.lane.b32.xlu0 %v3252_v13, %s3324_s19  ;;  %v4651_v37 = vpop.eup %3253  ;;  %vm1482_vm9 = vweird.f32 %v4588_v51 }
 0x1c8   : > { %3259 = vpow2.f32 %v2949_v5  ;;  %v4657_v38 = vpop.eup %3255  ;;  %v1516_v5 = vand.u32 2147483647, %v4505_v26  ;;  %v1478_v21 = vmul.f32 %v4651_v37, %v4588_v51  ;;  %v1616_v22 = vadd.f32 %v4625_v60, %v1615_v7 }
 0x1c9   : > { %v1493_v26 = vmul.f32 %v4657_v38, %v4610_v19  ;;  %vm1498_vm6 = vweird.f32 %v4657_v38  ;;  %vm1483_vm7 = vweird.f32 %v4651_v37 }
 0x1ca   : > { %2081 = vrot.lane.b32.xlu2 %v1998_v58, %s3324_s19  ;;  %v1458_v58 = vand.u32 2147483648, %v4492_v61  ;;  %v1455_v61 = vsel %vm1454_vm15, %v4564_v2, %v1451_v41  ;;  %vm1517_vm0 = vcmp.eq.f32.partialorder %v1516_v5, 8.507059e+37  ;;  %v1479_v41 = vsub.f32 1.0, %v1478_v21  ;;  %vm1499_vm10 = vmor %vm1497_vm8, %vm1498_vm6 }
 0x1cb   : > { %v2054_v34 = vpop.permute.xlu0 %2053  ;;  %v4697_v45 = vsel %vm1517_vm0, %v1519_v57, %v1515_v31  ;;  %v1494_v16 = vsub.f32 1.0, %v1493_v26  ;;  %v1623_v5 = vand.u32 2147483648, %v4552_v29  ;;  %v1621_v26 = vand.u32 2147483647, %v4552_v29  ;;  %vm1484_vm11 = vmor %vm1482_vm9, %vm1483_vm7 }
 0x1cc   : > { %v4664_v18 = vadd.f32 %v2054_v34, %v1824_v30  ;;  %v1932_v63 = vpop.permute.xlu2 %1931  ;;  %v1825_v30 = vmul.f32 %v3701_v0, %v4119_v49  ;;  %v1459_v34 = vor.u32 1.1754944e-38, %v1458_v58  ;;  %v1829_v58 = vmul.f32 %v3729_v35, %v4256_v62 }
 0x1cd   : > { %v3258_v10 = vpop.eup %3257  ;;  %v1924_v13 = vpop.permute.xlu1 %1923  ;;  %v2003_v27 = vmul.f32 %v1932_v63, %v4697_v45  ;;  %v1495_v35 = vmul.f32 %v4657_v38, %v1494_v16  ;;  %v1620_v29 = vsel %vm1619_vm4, %v4625_v60, %v1616_v22  ;;  %v1480_v31 = vmul.f32 %v4651_v37, %v1479_v41 }
 0x1ce   : > { %2249 = vrot.lane.b32.xlu1 %v3258_v10, %s3324_s19  ;;  %3261 = vtanh.f32 %v4664_v18  ;;  %v3260_v53 = vpop.eup %3259  ;;  %v1624_v7 = vor.u32 1.1754944e-38, %v1623_v5  ;;  %vm1622_vm5 = vcmp.eq.f32.partialorder %v1621_v26, 8.507059e+37  ;;  %v1501_v22 = vand.u32 2147483647, %v4610_v19 }
 0x1cf   : > { %2101 = vrot.lane.b32.xlu0 %v2008_v42, %s3324_s19  ;;  %v4695_v10 = vadd.f32 1.0, %v3260_v53  ;;  %v4701_v42 = vsel %vm1457_vm1, %v1459_v34, %v1455_v61  ;;  %v1496_v57 = vadd.f32 %v4657_v38, %v1495_v35  ;;  %v1503_v34 = vand.u32 2147483648, %v4610_v19 }
 0x1d0   : > { %v1999_v0 = vmul.f32 %v1924_v13, %v4701_v42  ;;  %v4725_v21 = vsel %vm1622_vm5, %v1624_v7, %v1620_v29  ;;  %vm1502_vm12 = vcmp.eq.f32.partialorder %v1501_v22, 8.507059e+37 }
 0x1d1   : > { %3263 = vrcp.f32 %v4695_v10  ;;  %vm1527_vm15 = vweird.f32 %v4695_v10 }
 0x1d3   : > { %v1946_v2 = vpop.permute.xlu0 %1945 }
 0x1d4   : > { %v3262_v1 = vpop.eup %3261  ;;  %v2010_v61 = vmul.f32 %v1946_v2, %v4725_v21 }
 0x1d5   : > { %v2056_v20 = vpop.permute.xlu1 %2055  ;;  %2245 = vrot.lane.b32.xlu2 %v3262_v1, %s3324_s19  ;;  %v2064_v53 = vpop.permute.xlu2 %2063  ;;  %v1486_v1 = vand.u32 2147483647, %v4588_v51 }
 0x1d6   : > { %v4710_v63 = vadd.f32 %v2056_v20, %v1825_v30  ;;  %2091 = vrot.lane.b32.xlu1 %v2003_v27, %s3324_s19  ;;  %v4718_v13 = vadd.f32 %v2064_v53, %v1829_v58  ;;  %v1481_v30 = vadd.f32 %v4651_v37, %v1480_v31  ;;  %v1488_v27 = vand.u32 2147483648, %v4588_v51 }
 0x1d7   : > { %2083 = vrot.lane.b32.xlu0 %v1999_v0, %s3324_s19  ;;  %v3264_v16 = vpop.eup %3263  ;;  %v1500_v0 = vsel %vm1499_vm10, %v4657_v38, %v1496_v57  ;;  %v1504_v20 = vor.u32 1.1754944e-38, %v1503_v34  ;;  %vm1487_vm13 = vcmp.eq.f32.partialorder %v1486_v1, 8.507059e+37  ;;  %v1827_v38 = vmul.f32 %v3703_v3, %v4202_v8 }
 0x1d8   : > { %3265 = vtanh.f32 %v4710_v63  ;;  %v1485_v5 = vsel %vm1484_vm11, %v4651_v37, %v1481_v30  ;;  %v1523_v58 = vmul.f32 %v3264_v16, %v4695_v10  ;;  %v1489_v26 = vor.u32 1.1754944e-38, %v1488_v27 }
 0x1d9   : > { %3267 = vtanh.f32 %v4718_v13  ;;  %v4744_v51 = vsel %vm1502_vm12, %v1504_v20, %v1500_v0  ;;  %v1828_v57 = vmul.f32 %v3717_v23, %v4222_v12  ;;  %vm1528_vm14 = vweird.f32 %v3264_v16 }
 0x1da   : > { %v4746_v53 = vsel %vm1487_vm13, %v1489_v26, %v1485_v5  ;;  %v1524_v31 = vsub.f32 1.0, %v1523_v58  ;;  %v1531_v23 = vand.u32 2147483647, %v4695_v10  ;;  %vm1529_vm0 = vmor %vm1527_vm15, %vm1528_vm14  ;;  %v5210_v5 = vld [vmem:[#allocation3_spill] sm:$0xff] }
 0x1db   : > { %v1928_v60 = vpop.permute.xlu0 %1927  ;;  %v1831_v20 = vmul.f32 %v5210_v5, %v4266_v17 }
 0x1dc   : > { %v2001_v37 = vmul.f32 %v1928_v60, %v4746_v53  ;;  %v1525_v30 = vmul.f32 %v3264_v16, %v1524_v31  ;;  %v5209_v60 = vld [vmem:[#allocation5_spill] sm:$0xff]  ;;  %vm1532_vm1 = vcmp.eq.f32.partialorder %v1531_v23, 8.507059e+37 }
 0x1dd   : > { %2105 = vrot.lane.b32.xlu2 %v2010_v61, %s3324_s19  ;;  %v1832_v27 = vmul.f32 %v5209_v60, %v4328_v28 }
 0x1de   : > { %v3266_v41 = vpop.eup %3265  ;;  %v1526_v3 = vadd.f32 %v3264_v16, %v1525_v30 }
 0x1df   : > { %v3268_v2 = vpop.eup %3267  ;;  %2247 = vrot.lane.b32.xlu0 %v3266_v41, %s3324_s19  ;;  %v1533_v41 = vand.u32 2147483648, %v4695_v10 }
 0x1e0   : > { %2255 = vrot.lane.b32.xlu1 %v3268_v2, %s3324_s19  ;;  %v1930_v19 = vpop.permute.xlu1 %1929 }
 0x1e1   : > { %v2002_v35 = vmul.f32 %v1930_v19, %v4744_v51  ;;  %v1530_v19 = vsel %vm1529_vm0, %v3264_v16, %v1526_v3  ;;  %v5212_v3 = vld [vmem:[#allocation6_spill] sm:$0xff] }
 0x1e2   : > { %v1834_v60 = vmul.f32 %v5212_v3, %v4302_v14 }
 0x1e3   : > { %v2060_v29 = vpop.permute.xlu0 %2059 }
 0x1e4   : > { %v4752_v7 = vadd.f32 %v2060_v29, %v1827_v38  ;;  %v5211_v29 = vld [vmem:[#allocation2_spill] sm:$0xff] }
 0x1e5   : > { %2087 = vrot.lane.b32.xlu2 %v2001_v37, %s3324_s19  ;;  %v1830_v31 = vmul.f32 %v5211_v29, %v4282_v4 }
 0x1e6   : > { %3269 = vtanh.f32 %v4752_v7 }
 0x1e7   : > { %2089 = vrot.lane.b32.xlu0 %v2002_v35, %s3324_s19  ;;  %v1534_v35 = vor.u32 1.1754944e-38, %v1533_v41 }
 0x1e8   : > { %v2062_v61 = vpop.permute.xlu1 %2061 }
 0x1e9   : > { %v4759_v34 = vadd.f32 %v2062_v61, %v1828_v57  ;;  %v4776_v10 = vsel %vm1532_vm1, %v1534_v35, %v1530_v19 }
 0x1eb   : > { %3271 = vtanh.f32 %v4759_v34  ;;  %v1934_v1 = vpop.permute.xlu0 %1933 }
 0x1ec   : > { %v3270_v22 = vpop.eup %3269  ;;  %v2004_v37 = vmul.f32 %v1934_v1, %v4776_v10  ;;  %v5213_v1 = vld [vmem:[#allocation8_spill] sm:$0xff] }
 0x1ed   : > { %v2070_v2 = vpop.permute.xlu2 %2069  ;;  %2251 = vrot.lane.b32.xlu2 %v3270_v22, %s3324_s19 }
 0x1ee   : > { %v4768_v0 = vadd.f32 %v2070_v2, %v1832_v27  ;;  %v1835_v2 = vmul.f32 %v5213_v1, %v4440_v36 }
 0x1f0   : > { %3273 = vtanh.f32 %v4768_v0  ;;  %v2068_v58 = vpop.permute.xlu1 %2067 }
 0x1f1   : > { %v3272_v26 = vpop.eup %3271  ;;  %v4773_v38 = vadd.f32 %v2068_v58, %v1831_v20  ;;  %v5214_v58 = vld [vmem:[#allocation4_spill] sm:$0xff] }
 0x1f2   : > { %2253 = vrot.lane.b32.xlu0 %v3272_v26, %s3324_s19  ;;  %v1833_v26 = vmul.f32 %v5214_v58, %v4354_v9 }
 0x1f3   : > { %3275 = vtanh.f32 %v4773_v38 }
 0x1f5   : > { %v2066_v16 = vpop.permute.xlu0 %2065  ;;  %2093 = vrot.lane.b32.xlu2 %v2004_v37, %s3324_s19 }
 0x1f6   : > { %v3274_v57 = vpop.eup %3273  ;;  %v4783_v61 = vadd.f32 %v2066_v16, %v1830_v31  ;;  %v5215_v16 = vld [vmem:[#allocation18_spill] sm:$0xff] }
 0x1f7   : > { %2261 = vrot.lane.b32.xlu1 %v3274_v57, %s3324_s19  ;;  %v1846_v57 = vmul.f32 %v5215_v16, %v4386_v6 }
 0x1f8   : > { %3277 = vtanh.f32 %v4783_v61 }
 0x1f9   : > { %v3276_v30 = vpop.eup %3275 }
 0x1fa   : > { %2259 = vrot.lane.b32.xlu0 %v3276_v30, %s3324_s19 }
 0x1fd   : > { %v2074_v27 = vpop.permute.xlu1 %2073 }
 0x1fe   : > { %v3278_v22 = vpop.eup %3277  ;;  %v4790_v41 = vadd.f32 %v2074_v27, %v1834_v60 }
 0x1ff   : > { %2257 = vrot.lane.b32.xlu2 %v3278_v22, %s3324_s19  ;;  %v5216_v22 = vld [vmem:[#allocation20_spill] sm:$0xff] }
 0x200   : > { %3279 = vtanh.f32 %v4790_v41  ;;  %v1847_v1 = vmul.f32 %v5216_v22, %v4582_v54 }
 0x205   : > { %v2076_v23 = vpop.permute.xlu2 %2075 }
 0x206   : > { %v3280_v5 = vpop.eup %3279  ;;  %v4796_v20 = vadd.f32 %v2076_v23, %v1835_v2  ;;  %v5217_v2 = vld [vmem:[#allocation9_spill] sm:$0xff] }
 0x207   : > { %2265 = vrot.lane.b32.xlu0 %v3280_v5, %s3324_s19  ;;  %v1837_v23 = vmul.f32 %v5217_v2, %v4438_v59 }
 0x208   : > { %3281 = vtanh.f32 %v4796_v20 }
 0x20c   : > { %v2238_v19 = vpop.permute.xlu1 %2237 }
 0x20d   : > { %v2332_v35 = vmul.f32 %v2238_v19, %v3909_v33  ;;  %v2072_v37 = vpop.permute.xlu0 %2071 }
 0x20e   : > { %v3282_v29 = vpop.eup %3281  ;;  %v4803_v31 = vadd.f32 %v2072_v37, %v1833_v26 }
 0x20f   : > { %2267 = vrot.lane.b32.xlu1 %v3282_v29, %s3324_s19  ;;  %2397 = vrot.lane.b32.xlu0 %v2332_v35, %s3325_s25  ;;  %v5218_v29 = vld [vmem:[#allocation11_spill] sm:$0xff] }
 0x210   : > { %3283 = vtanh.f32 %v4803_v31  ;;  %v1838_v16 = vmul.f32 %v5218_v29, %v4637_v43 }
 0x214   : > { %v2240_v30 = vpop.permute.xlu2 %2239  ;;  %v2098_v3 = vpop.permute.xlu1 %2097 }
 0x215   : > { %v2333_v60 = vmul.f32 %v2240_v30, %v3944_v44  ;;  %v4811_v27 = vadd.f32 %v2098_v3, %v1846_v57  ;;  %v5219_v30 = vld [vmem:[#allocation16_spill] sm:$0xff] }
 0x216   : > { %v3284_v33 = vpop.eup %3283  ;;  %v1845_v3 = vmul.f32 %v5219_v30, %v4484_v39 }
 0x217   : > { %3285 = vtanh.f32 %v4811_v27  ;;  %2263 = vrot.lane.b32.xlu2 %v3284_v33, %s3324_s19  ;;  %2399 = vrot.lane.b32.xlu1 %v2333_v60, %s3325_s25 }
 0x21c   : > { %v2100_v5 = vpop.permute.xlu2 %2099  ;;  %v2080_v19 = vpop.permute.xlu1 %2079 }
 0x21d   : > { %v3286_v58 = vpop.eup %3285  ;;  %v4820_v26 = vadd.f32 %v2100_v5, %v1847_v1  ;;  %v4822_v44 = vadd.f32 %v2080_v19, %v1837_v23  ;;  %v2236_v35 = vpop.permute.xlu0 %2235  ;;  %v5220_v23 = vld [vmem:[#allocation7_spill] sm:$0xff] }
 0x21e   : > { %v2331_v37 = vmul.f32 %v2236_v35, %v3873_v55  ;;  %2289 = vrot.lane.b32.xlu0 %v3286_v58, %s3324_s19  ;;  %v1836_v5 = vmul.f32 %v5220_v23, %v4540_v47  ;;  %v5223_v23 = vld [vmem:[#allocation12_spill] sm:$0xff] }
 0x21f   : > { %3287 = vtanh.f32 %v4820_v26 }
 0x220   : > { %3289 = vtanh.f32 %v4822_v44  ;;  %2395 = vrot.lane.b32.xlu2 %v2331_v37, %s3325_s25 }
 0x224   : > { %v2082_v57 = vpop.permute.xlu2 %2081 }
 0x225   : > { %v3288_v60 = vpop.eup %3287  ;;  %v4833_v33 = vadd.f32 %v2082_v57, %v1838_v16  ;;  %v2096_v22 = vpop.permute.xlu0 %2095  ;;  %v5221_v16 = vld [vmem:[#allocation21_spill] sm:$0xff] }
 0x226   : > { %v3290_v55 = vpop.eup %3289  ;;  %v4835_v1 = vadd.f32 %v2096_v22, %v1845_v3  ;;  %2291 = vrot.lane.b32.xlu1 %v3288_v60, %s3324_s19  ;;  %v1849_v57 = vmul.f32 %v5221_v16, %v4568_v11 }
 0x227   : > { %3291 = vtanh.f32 %v4833_v33  ;;  %2271 = vrot.lane.b32.xlu0 %v3290_v55, %s3324_s19  ;;  %v2244_v2 = vpop.permute.xlu1 %2243  ;;  %v5222_v55 = vld [vmem:[#allocation22_spill] sm:$0xff] }
 0x228   : > { %3293 = vtanh.f32 %v4835_v1  ;;  %v2335_v58 = vmul.f32 %v2244_v2, %v4036_v46  ;;  %v1850_v2 = vmul.f32 %v5222_v55, %v4725_v21  ;;  %v5226_v55 = vld [vmem:[#allocation19_spill] sm:$0xff] }
 0x22d   : > { %v3292_v19 = vpop.eup %3291  ;;  %v2078_v35 = vpop.permute.xlu0 %2077 }
 0x22e   : > { %v3294_v37 = vpop.eup %3293  ;;  %v4844_v29 = vadd.f32 %v2078_v35, %v1836_v5  ;;  %2273 = vrot.lane.b32.xlu1 %v3292_v19, %s3324_s19  ;;  %v1840_v5 = vmul.f32 %v5223_v23, %v4620_v15 }
 0x22f   : > { %2403 = vrot.lane.b32.xlu0 %v2335_v58, %s3325_s25  ;;  %2287 = vrot.lane.b32.xlu2 %v3294_v37, %s3324_s19  ;;  %v2246_v30 = vpop.permute.xlu2 %2245  ;;  %v2104_v3 = vpop.permute.xlu1 %2103 }
 0x230   : > { %3295 = vtanh.f32 %v4844_v29  ;;  %v4852_v60 = vadd.f32 %v2104_v3, %v1849_v57  ;;  %v2336_v46 = vmul.f32 %v2246_v30, %v4075_v40  ;;  %v5225_v30 = vld [vmem:[#allocation14_spill] sm:$0xff] }
 0x231   : > { %v1841_v3 = vmul.f32 %v5225_v30, %v4746_v53 }
 0x232   : > { %3297 = vtanh.f32 %v4852_v60 }
 0x236   : > { %v3296_v22 = vpop.eup %3295  ;;  %2405 = vrot.lane.b32.xlu1 %v2336_v46, %s3325_s25 }
 0x237   : > { %2269 = vrot.lane.b32.xlu2 %v3296_v22, %s3324_s19  ;;  %v2106_v19 = vpop.permute.xlu2 %2105  ;;  %v2086_v58 = vpop.permute.xlu1 %2085 }
 0x238   : > { %v3298_v35 = vpop.eup %3297  ;;  %v4862_v37 = vadd.f32 %v2106_v19, %v1850_v2  ;;  %v4864_v16 = vadd.f32 %v2086_v58, %v1840_v5  ;;  %v1848_v2 = vmul.f32 %v5226_v55, %v4659_v25 }
 0x239   : > { %v2242_v57 = vpop.permute.xlu0 %2241  ;;  %2295 = vrot.lane.b32.xlu0 %v3298_v35, %s3324_s19 }
 0x23a   : > { %5224 = vst [vmem:[#allocation5_spill] sm:$0xff] %v4862_v37  ;;  %3299 = vtanh.f32 %v4862_v37  ;;  %v2334_v40 = vmul.f32 %v2242_v57, %v3993_v32  ;;  %v5228_v32 = vld [vmem:[#allocation15_spill] sm:$0xff] }
 0x23b   : > { %3301 = vtanh.f32 %v4864_v16  ;;  %v1843_v57 = vmul.f32 %v5228_v32, %v4697_v45 }
 0x23f   : > { %2401 = vrot.lane.b32.xlu2 %v2334_v40, %s3325_s25  ;;  %v2088_v46 = vpop.permute.xlu2 %2087 }
 0x240   : > { %v2250_v22 = vpop.permute.xlu1 %2249  ;;  %v3300_v23 = vpop.eup %3299  ;;  %v4875_v5 = vadd.f32 %v2088_v46, %v1841_v3  ;;  %v5229_v3 = vld [vmem:[#allocation10_spill] sm:$0xff] }
 0x241   : > { %v2102_v19 = vpop.permute.xlu0 %2101  ;;  %v3302_v58 = vpop.eup %3301  ;;  %2297 = vrot.lane.b32.xlu1 %v3300_v23, %s3324_s19  ;;  %v1839_v46 = vmul.f32 %v5229_v3, %v4701_v42 }
 0x242   : > { %5227 = vst [vmem:[#allocation3_spill] sm:$0xff] %v4875_v5  ;;  %v4877_v35 = vadd.f32 %v2102_v19, %v1848_v2  ;;  %3303 = vtanh.f32 %v4875_v5  ;;  %2277 = vrot.lane.b32.xlu0 %v3302_v58, %s3324_s19  ;;  %v2338_v2 = vmul.f32 %v2250_v22, %v4155_v24  ;;  %v5230_v58 = vld [vmem:[#allocation17_spill] sm:$0xff] }
 0x243   : > { %v1844_v32 = vmul.f32 %v5230_v58, %v4776_v10 }
 0x244   : > { %3305 = vtanh.f32 %v4877_v35 }
 0x247   : > { %v2252_v40 = vpop.permute.xlu2 %2251 }
 0x248   : > { %v2092_v30 = vpop.permute.xlu1 %2091  ;;  %v3304_v55 = vpop.eup %3303  ;;  %v2339_v24 = vmul.f32 %v2252_v40, %v4202_v8 }
 0x249   : > { %v4888_v19 = vadd.f32 %v2092_v30, %v1843_v57  ;;  %v2084_v23 = vpop.permute.xlu0 %2083  ;;  %2279 = vrot.lane.b32.xlu1 %v3304_v55, %s3324_s19  ;;  %v5231_v55 = vld [vmem:[#allocation13_spill] sm:$0xff] }
 0x24a   : > { %v3306_v37 = vpop.eup %3305  ;;  %v4890_v5 = vadd.f32 %v2084_v23, %v1839_v46  ;;  %2409 = vrot.lane.b32.xlu0 %v2338_v2, %s3325_s25  ;;  %v1842_v2 = vmul.f32 %v5231_v55, %v4744_v51 }
 0x24b   : > { %3307 = vtanh.f32 %v4888_v19  ;;  %2293 = vrot.lane.b32.xlu2 %v3306_v37, %s3324_s19 }
 0x24c   : > { %3309 = vtanh.f32 %v4890_v5 }
 0x24f   : > { %v2094_v22 = vpop.permute.xlu2 %2093 }
 0x250   : > { %v4900_v30 = vadd.f32 %v2094_v22, %v1844_v32 }
 0x251   : > { %v3308_v57 = vpop.eup %3307  ;;  %v2248_v3 = vpop.permute.xlu0 %2247  ;;  %2411 = vrot.lane.b32.xlu1 %v2339_v24, %s3325_s25 }
 0x252   : > { %v3310_v46 = vpop.eup %3309  ;;  %3311 = vtanh.f32 %v4900_v30  ;;  %2283 = vrot.lane.b32.xlu0 %v3308_v57, %s3324_s19  ;;  %v2256_v37 = vpop.permute.xlu1 %2255  ;;  %v2337_v8 = vmul.f32 %v2248_v3, %v4119_v49 }
 0x253   : > { %2275 = vrot.lane.b32.xlu2 %v3310_v46, %s3324_s19  ;;  %v2341_v40 = vmul.f32 %v2256_v37, %v4256_v62 }
 0x258   : > { %v3312_v23 = vpop.eup %3311 }
 0x259   : > { %v2090_v58 = vpop.permute.xlu0 %2089  ;;  %2285 = vrot.lane.b32.xlu1 %v3312_v23, %s3324_s19  ;;  %v2258_v24 = vpop.permute.xlu2 %2257 }
 0x25a   : > { %v4910_v32 = vadd.f32 %v2090_v58, %v1842_v2  ;;  %2415 = vrot.lane.b32.xlu0 %v2341_v40, %s3325_s25  ;;  %v2342_v22 = vmul.f32 %v2258_v24, %v4282_v4 }
 0x25b   : > { %2407 = vrot.lane.b32.xlu2 %v2337_v8, %s3325_s25 }
 0x25c   : > { %3313 = vtanh.f32 %v4910_v32 }
 0x261   : > { %2417 = vrot.lane.b32.xlu1 %v2342_v22, %s3325_s25 }
 0x262   : > { %v3314_v57 = vpop.eup %3313 }
 0x263   : > { %2281 = vrot.lane.b32.xlu2 %v3314_v57, %s3324_s19 }
 0x264   : > { %v2254_v49 = vpop.permute.xlu0 %2253 }
 0x265   : > { %v2340_v62 = vmul.f32 %v2254_v49, %v4222_v12 }
 0x269   : > { %v2262_v3 = vpop.permute.xlu1 %2261 }
 0x26a   : > { %v2344_v46 = vmul.f32 %v2262_v3, %v4328_v28 }
 0x26b   : > { %2413 = vrot.lane.b32.xlu2 %v2340_v62, %s3325_s25 }
 0x26c   : > { %2421 = vrot.lane.b32.xlu0 %v2344_v46, %s3325_s25  ;;  %v2260_v37 = vpop.permute.xlu0 %2259  ;;  %v5233_v46 = vld [vmem:[#allocation23_spill] sm:$0xff] }
 0x26d   : > { %v2343_v55 = vmul.f32 %v2260_v37, %v4266_v17 }
 0x271   : > { %v2264_v4 = vpop.permute.xlu2 %2263 }
 0x272   : > { %v2345_v2 = vmul.f32 %v2264_v4, %v4354_v9 }
 0x273   : > { %2419 = vrot.lane.b32.xlu2 %v2343_v55, %s3325_s25 }
 0x274   : > { %2423 = vrot.lane.b32.xlu1 %v2345_v2, %s3325_s25 }
 0x279   : > { %v2266_v12 = vpop.permute.xlu0 %2265 }
 0x27a   : > { %v2396_v17 = vpop.permute.xlu2 %2395  ;;  %v2346_v28 = vmul.f32 %v2266_v12, %v4302_v14 }
 0x27b   : > { %2492 = vst.msk [vmem:[%s4932_s28] sm:$0xff] %vm2491_vm2, %v2396_v17 }
 0x27c   : > { %2525 = vst.msk [vmem:[%s4932_s28] sm:$0xff] %vm2524_vm3, %v4395_v56  ;;  %2425 = vrot.lane.b32.xlu2 %v2346_v28, %s3325_s25  ;;  %v5232_v56 = vld [vmem:[#allocation24_spill] sm:$0xff] }
 0x281   : > { %v2268_v9 = vpop.permute.xlu1 %2267  ;;  %v2398_v23 = vpop.permute.xlu0 %2397 }
 0x282   : > { %v2347_v8 = vmul.f32 %v2268_v9, %v4440_v36  ;;  %2493 = vst.msk [vmem:[%s4932_s28 + $0x8] sm:$0xff] %vm2491_vm2, %v2398_v23 }
 0x283   : > { %2526 = vst.msk [vmem:[%s4932_s28 + $0x8] sm:$0xff] %vm2524_vm3, %v4337_v48 }
 0x284   : > { %2427 = vrot.lane.b32.xlu0 %v2347_v8, %s3325_s25 }
 0x289   : > { %v2288_v40 = vpop.permute.xlu2 %2287  ;;  %v2400_v14 = vpop.permute.xlu1 %2399 }
 0x28a   : > { %v2357_v58 = vmul.f32 %v2288_v40, %v4484_v39  ;;  %2494 = vst.msk [vmem:[%s4932_s28 + $0x10] sm:$0xff] %vm2491_vm2, %v2400_v14 }
 0x28b   : > { %2527 = vst.msk [vmem:[%s4932_s28 + $0x10] sm:$0xff] %vm2524_vm3, %v5232_v56 }
 0x28c   : > { %2447 = vrot.lane.b32.xlu1 %v2357_v58, %s3325_s25  ;;  %v5235_v58 = vld [vmem:[#allocation5_spill] sm:$0xff] }
 0x290   : > { %v2290_v36 = vpop.permute.xlu0 %2289 }
 0x291   : > { %v2270_v24 = vpop.permute.xlu2 %2269  ;;  %v2358_v22 = vmul.f32 %v2290_v36, %v4386_v6 }
 0x292   : > { %v2348_v48 = vmul.f32 %v2270_v24, %v4540_v47 }
 0x293   : > { %2449 = vrot.lane.b32.xlu2 %v2358_v22, %s3325_s25 }
 0x294   : > { %2429 = vrot.lane.b32.xlu1 %v2348_v48, %s3325_s25 }
 0x298   : > { %v2292_v39 = vpop.permute.xlu1 %2291 }
 0x299   : > { %v2359_v57 = vmul.f32 %v2292_v39, %v4582_v54  ;;  %v2402_v49 = vpop.permute.xlu2 %2401  ;;  %v2272_v62 = vpop.permute.xlu0 %2271 }
 0x29a   : > { %2495 = vst.msk [vmem:[%s4932_s28 + $0x18] sm:$0xff] %vm2491_vm2, %v2402_v49  ;;  %v2349_v3 = vmul.f32 %v2272_v62, %v4438_v59 }
 0x29b   : > { %2528 = vst.msk [vmem:[%s4932_s28 + $0x18] sm:$0xff] %vm2524_vm3, %v4585_v50  ;;  %2451 = vrot.lane.b32.xlu0 %v2359_v57, %s3325_s25 }
 0x29c   : > { %2431 = vrot.lane.b32.xlu2 %v2349_v3, %s3325_s25 }
 0x2a0   : > { %v2274_v6 = vpop.permute.xlu1 %2273 }
 0x2a1   : > { %v2350_v47 = vmul.f32 %v2274_v6, %v4637_v43  ;;  %v2404_v54 = vpop.permute.xlu0 %2403 }
 0x2a2   : > { %2496 = vst.msk [vmem:[%s4932_s28 + $0x20] sm:$0xff] %vm2491_vm2, %v2404_v54 }
 0x2a3   : > { %2529 = vst.msk [vmem:[%s4932_s28 + $0x20] sm:$0xff] %vm2524_vm3, %v5233_v46  ;;  %2433 = vrot.lane.b32.xlu0 %v2350_v47, %s3325_s25 }
 0x2a5   : > { %v2294_v59 = vpop.permute.xlu2 %2293 }
 0x2a6   : > { %v2360_v8 = vmul.f32 %v2294_v59, %v4659_v25 }
 0x2a8   : > { %v2406_v37 = vpop.permute.xlu1 %2405 }
 0x2a9   : > { %2497 = vst.msk [vmem:[%s4932_s28 + $0x28] sm:$0xff] %vm2491_vm2, %v2406_v37 }
 0x2aa   : > { %2530 = vst.msk [vmem:[%s4932_s28 + $0x28] sm:$0xff] %vm2524_vm3, %v4664_v18 }
 0x2ab   : > { %v2296_v50 = vpop.permute.xlu0 %2295 }
 0x2ad   : > { %v2276_v43 = vpop.permute.xlu2 %2275 }
 0x2ae   : > { %v2351_v55 = vmul.f32 %v2276_v43, %v4701_v42 }
 0x2b0   : > { %2435 = vrot.lane.b32.xlu1 %v2351_v55, %s3325_s25 }
 0x2b3   : > { %v2298_v4 = vpop.permute.xlu1 %2297 }
 0x2b4   : > { %v2278_v12 = vpop.permute.xlu0 %2277 }
 0x2b5   : > { %v2408_v2 = vpop.permute.xlu2 %2407  ;;  %v2352_v17 = vmul.f32 %v2278_v12, %v4620_v15 }
 0x2b6   : > { %2498 = vst.msk [vmem:[%s4932_s28 + $0x30] sm:$0xff] %vm2491_vm2, %v2408_v2 }
 0x2b7   : > { %2531 = vst.msk [vmem:[%s4932_s28 + $0x30] sm:$0xff] %vm2524_vm3, %v4710_v63  ;;  %2437 = vrot.lane.b32.xlu2 %v2352_v17, %s3325_s25 }
 0x2bb   : > { %v2280_v18 = vpop.permute.xlu1 %2279 }
 0x2bc   : > { %v2353_v42 = vmul.f32 %v2280_v18, %v4746_v53  ;;  %v2410_v9 = vpop.permute.xlu0 %2409 }
 0x2bd   : > { %v2282_v28 = vpop.permute.xlu2 %2281  ;;  %2499 = vst.msk [vmem:[%s4932_s28 + $0x38] sm:$0xff] %vm2491_vm2, %v2410_v9 }
 0x2be   : > { %v2354_v23 = vmul.f32 %v2282_v28, %v4744_v51  ;;  %2532 = vst.msk [vmem:[%s4932_s28 + $0x38] sm:$0xff] %vm2524_vm3, %v4629_v52  ;;  %2439 = vrot.lane.b32.xlu0 %v2353_v42, %s3325_s25 }
 0x2c0   : > { %2441 = vrot.lane.b32.xlu1 %v2354_v23, %s3325_s25 }
 0x2c3   : > { %v2412_v15 = vpop.permute.xlu1 %2411 }
 0x2c4   : > { %2500 = vst.msk [vmem:[%s4932_s28 + $0x40] sm:$0xff] %vm2491_vm2, %v2412_v15  ;;  %v2284_v53 = vpop.permute.xlu0 %2283 }
 0x2c5   : > { %v2414_v63 = vpop.permute.xlu2 %2413  ;;  %2533 = vst.msk [vmem:[%s4932_s28 + $0x40] sm:$0xff] %vm2524_vm3, %v4752_v7  ;;  %v2355_v52 = vmul.f32 %v2284_v53, %v4697_v45  ;;  %v2361_v45 = vmul.f32 %v2296_v50, %v4568_v11 }
 0x2c6   : > { %2501 = vst.msk [vmem:[%s4932_s28 + $0x48] sm:$0xff] %vm2491_vm2, %v2414_v63 }
 0x2c7   : > { %2534 = vst.msk [vmem:[%s4932_s28 + $0x48] sm:$0xff] %vm2524_vm3, %v4759_v34  ;;  %2443 = vrot.lane.b32.xlu2 %v2355_v52, %s3325_s25  ;;  %v2362_v34 = vmul.f32 %v2298_v4, %v4725_v21 }
 0x2c8   : > { %2453 = vrot.lane.b32.xlu1 %v2360_v8, %s3325_s25 }
 0x2cb   : > { %v2286_v51 = vpop.permute.xlu1 %2285 }
 0x2cc   : > { %v2356_v25 = vmul.f32 %v2286_v51, %v4776_v10  ;;  %v2416_v7 = vpop.permute.xlu0 %2415 }
 0x2cd   : > { %v2420_v40 = vpop.permute.xlu2 %2419  ;;  %2502 = vst.msk [vmem:[%s4932_s28 + $0x50] sm:$0xff] %vm2491_vm2, %v2416_v7 }
 0x2ce   : > { %2504 = vst.msk [vmem:[%s4932_s28 + $0x60] sm:$0xff] %vm2491_vm2, %v2420_v40  ;;  %2445 = vrot.lane.b32.xlu0 %v2356_v25, %s3325_s25 }
 0x2cf   : > { %2537 = vst.msk [vmem:[%s4932_s28 + $0x60] sm:$0xff] %vm2524_vm3, %v4773_v38  ;;  %2455 = vrot.lane.b32.xlu2 %v2361_v45, %s3325_s25 }
 0x2d0   : > { %2535 = vst.msk [vmem:[%s4932_s28 + $0x50] sm:$0xff] %vm2524_vm3, %v4718_v13 }
 0x2d3   : > { %v2418_v11 = vpop.permute.xlu1 %2417 }
 0x2d4   : > { %2503 = vst.msk [vmem:[%s4932_s28 + $0x58] sm:$0xff] %vm2491_vm2, %v2418_v11 }
 0x2d5   : > { %2536 = vst.msk [vmem:[%s4932_s28 + $0x58] sm:$0xff] %vm2524_vm3, %v4783_v61 }
 0x2d6   : > { %v2426_v38 = vpop.permute.xlu2 %2425  ;;  %2457 = vrot.lane.b32.xlu0 %v2362_v34, %s3325_s25 }
 0x2d7   : > { %2507 = vst.msk [vmem:[%s4932_s28 + $0x78] sm:$0xff] %vm2491_vm2, %v2426_v38 }
 0x2d8   : > { %2540 = vst.msk [vmem:[%s4932_s28 + $0x78] sm:$0xff] %vm2524_vm3, %v4790_v41 }
 0x2de   : > { %v2422_v13 = vpop.permute.xlu0 %2421 }
 0x2df   : > { %2505 = vst.msk [vmem:[%s4932_s28 + $0x68] sm:$0xff] %vm2491_vm2, %v2422_v13 }
 0x2e0   : > { %2538 = vst.msk [vmem:[%s4932_s28 + $0x68] sm:$0xff] %vm2524_vm3, %v4768_v0 }
 0x2e6   : > { %v2424_v21 = vpop.permute.xlu1 %2423 }
 0x2e7   : > { %2506 = vst.msk [vmem:[%s4932_s28 + $0x70] sm:$0xff] %vm2491_vm2, %v2424_v21 }
 0x2e8   : > { %2539 = vst.msk [vmem:[%s4932_s28 + $0x70] sm:$0xff] %vm2524_vm3, %v4803_v31 }
 0x2ed   : > { %v2450_v10 = vpop.permute.xlu2 %2449 }
 0x2ee   : > { %2519 = vst.msk [vmem:[%s4932_s28 + $0xd8] sm:$0xff] %vm2491_vm2, %v2450_v10 }
 0x2ef   : > { %2552 = vst.msk [vmem:[%s4932_s28 + $0xd8] sm:$0xff] %vm2524_vm3, %v4811_v27 }
 0x2f6   : > { %v2432_v61 = vpop.permute.xlu2 %2431  ;;  %v2428_v41 = vpop.permute.xlu0 %2427 }
 0x2f7   : > { %2510 = vst.msk [vmem:[%s4932_s28 + $0x90] sm:$0xff] %vm2491_vm2, %v2432_v61 }
 0x2f8   : > { %2543 = vst.msk [vmem:[%s4932_s28 + $0x90] sm:$0xff] %vm2524_vm3, %v4822_v44 }
 0x2f9   : > { %2508 = vst.msk [vmem:[%s4932_s28 + $0x80] sm:$0xff] %vm2491_vm2, %v2428_v41 }
 0x2fa   : > { %2541 = vst.msk [vmem:[%s4932_s28 + $0x80] sm:$0xff] %vm2524_vm3, %v4796_v20 }
 0x2fe   : > { %v2448_v0 = vpop.permute.xlu1 %2447 }
 0x2ff   : > { %2518 = vst.msk [vmem:[%s4932_s28 + $0xd0] sm:$0xff] %vm2491_vm2, %v2448_v0 }
 0x300   : > { %2551 = vst.msk [vmem:[%s4932_s28 + $0xd0] sm:$0xff] %vm2524_vm3, %v4835_v1 }
 0x306   : > { %v2430_v31 = vpop.permute.xlu1 %2429 }
 0x307   : > { %2509 = vst.msk [vmem:[%s4932_s28 + $0x88] sm:$0xff] %vm2491_vm2, %v2430_v31 }
 0x308   : > { %2542 = vst.msk [vmem:[%s4932_s28 + $0x88] sm:$0xff] %vm2524_vm3, %v4844_v29 }
 0x30d   : > { %v2452_v27 = vpop.permute.xlu0 %2451 }
 0x30e   : > { %2520 = vst.msk [vmem:[%s4932_s28 + $0xe0] sm:$0xff] %vm2491_vm2, %v2452_v27 }
 0x30f   : > { %2553 = vst.msk [vmem:[%s4932_s28 + $0xe0] sm:$0xff] %vm2524_vm3, %v4820_v26 }
 0x311   : > { %v2438_v20 = vpop.permute.xlu2 %2437 }
 0x312   : > { %2513 = vst.msk [vmem:[%s4932_s28 + $0xa8] sm:$0xff] %vm2491_vm2, %v2438_v20 }
 0x313   : > { %2546 = vst.msk [vmem:[%s4932_s28 + $0xa8] sm:$0xff] %vm2524_vm3, %v4864_v16 }
 0x315   : > { %v2434_v44 = vpop.permute.xlu0 %2433 }
 0x316   : > { %2511 = vst.msk [vmem:[%s4932_s28 + $0x98] sm:$0xff] %vm2491_vm2, %v2434_v44 }
 0x317   : > { %2544 = vst.msk [vmem:[%s4932_s28 + $0x98] sm:$0xff] %vm2524_vm3, %v4833_v33 }
 0x321   : > { %v2444_v29 = vpop.permute.xlu2 %2443 }
 0x322   : > { %v2436_v1 = vpop.permute.xlu1 %2435  ;;  %2516 = vst.msk [vmem:[%s4932_s28 + $0xc0] sm:$0xff] %vm2491_vm2, %v2444_v29 }
 0x323   : > { %2512 = vst.msk [vmem:[%s4932_s28 + $0xa0] sm:$0xff] %vm2491_vm2, %v2436_v1 }
 0x324   : > { %2545 = vst.msk [vmem:[%s4932_s28 + $0xa0] sm:$0xff] %vm2524_vm3, %v4890_v5  ;;  %v5234_v5 = vld [vmem:[#allocation3_spill] sm:$0xff] }
 0x325   : > { %2549 = vst.msk [vmem:[%s4932_s28 + $0xc0] sm:$0xff] %vm2524_vm3, %v4888_v19 }
 0x329   : > { %v2456_v26 = vpop.permute.xlu2 %2455 }
 0x32a   : > { %2522 = vst.msk [vmem:[%s4932_s28 + $0xf0] sm:$0xff] %vm2491_vm2, %v2456_v26 }
 0x32b   : > { %2555 = vst.msk [vmem:[%s4932_s28 + $0xf0] sm:$0xff] %vm2524_vm3, %v4852_v60 }
 0x330   : > { %v2440_v33 = vpop.permute.xlu0 %2439 }
 0x331   : > { %2514 = vst.msk [vmem:[%s4932_s28 + $0xb0] sm:$0xff] %vm2491_vm2, %v2440_v33 }
 0x332   : > { %v2442_v16 = vpop.permute.xlu1 %2441  ;;  %2547 = vst.msk [vmem:[%s4932_s28 + $0xb0] sm:$0xff] %vm2524_vm3, %v5234_v5 }
 0x333   : > { %2515 = vst.msk [vmem:[%s4932_s28 + $0xb8] sm:$0xff] %vm2491_vm2, %v2442_v16 }
 0x334   : > { %2548 = vst.msk [vmem:[%s4932_s28 + $0xb8] sm:$0xff] %vm2524_vm3, %v4910_v32 }
 0x33a   : > { %v2454_v19 = vpop.permute.xlu1 %2453 }
 0x33b   : > { %2521 = vst.msk [vmem:[%s4932_s28 + $0xe8] sm:$0xff] %vm2491_vm2, %v2454_v19 }
 0x33c   : > { %2554 = vst.msk [vmem:[%s4932_s28 + $0xe8] sm:$0xff] %vm2524_vm3, %v4877_v35 }
 0x340   : > { %v2446_v14 = vpop.permute.xlu0 %2445 }
 0x341   : > { %2517 = vst.msk [vmem:[%s4932_s28 + $0xc8] sm:$0xff] %vm2491_vm2, %v2446_v14 }
 0x342   : > { %2550 = vst.msk [vmem:[%s4932_s28 + $0xc8] sm:$0xff] %vm2524_vm3, %v4900_v30 }
 0x348   : > { %v2458_v60 = vpop.permute.xlu0 %2457 }
 0x349   : > { %2523 = vst.msk [vmem:[%s4932_s28 + $0xf8] sm:$0xff] %vm2491_vm2, %v2458_v60 }
 0x34a   : > { %2556 = vst.msk [vmem:[%s4932_s28 + $0xf8] sm:$0xff] %vm2524_vm3, %v5235_v58 }
 0x34b PF: > { %s14_s15 = sadd.s32 1, %s3322_s15  }
 0x34c   : > { %p11_p4 = scmp.ge.s32.totalorder %s14_s15, 4  }
 0x34e   :  { %13 = sbr.rel (!%p11_p4) target bundleno = 1 (0x1), region = 69 }

</bundles_post_ra>
